<compile_context>
chip_gen: v5e
topology: v5e:2x2
jax: 0.10.0
libtpu: 0.0.40
codegen_flags: <defaults>
</compile_context>

<pallas_src>
import functools

import numpy as np
import jax
import jax.numpy as jnp
from jax.experimental import pallas as pl
from jax.experimental.pallas import tpu as pltpu

_LANES = 128
_SUBLANES = 8


def _freq_bands(n_freq, log_sampling=True):
    """Frequency bands as Python floats (baked into the kernel as immediates)."""
    if n_freq == 1:
        return [1.0]
    max_freq = float(n_freq - 1)
    if log_sampling:
        return [2.0 ** (max_freq * i / (n_freq - 1)) for i in range(n_freq)]
    lo, hi = 1.0, 2.0 ** max_freq
    return [lo + (hi - lo) * i / (n_freq - 1) for i in range(n_freq)]


def _round_up(a, b):
    return ((a + b - 1) // b) * b


def _terms_jnp(x, freqs, include_input):
    parts = []
    if include_input:
        parts.append(x)
    for f in freqs:
        parts.append(jnp.sin(f * x))
        parts.append(jnp.cos(f * x))
    return parts


def positional_encode_ref(x, n_freq, log_sampling=True, include_input=True):
    """Pure-JAX reference mirroring the PyTorch forward."""
    freqs = _freq_bands(n_freq, log_sampling)
    return jnp.concatenate(_terms_jnp(x, freqs, include_input), axis=-1)


def _pos_enc_kernel(x_ref, out_ref, *, freqs, include_input, fast_trig):
    """One lane-dense tile of positional encoding.

    x_ref:   (tile_r, 128)           flattened (B*C) input slab
    out_ref: (n_terms, tile_r, 128)  one dense slab per encoding term

    Term order matches PyTorch: [x?, sin(f0 x), cos(f0 x), sin(f1 x), ...].
    Pure VPU/EUP elementwise work: no MXU, no concatenate, no masked lane
    stores, frequencies are compile-time immediates.
    """
    odt = out_ref.dtype
    x = x_ref[...].astype(jnp.float32)
    t = 0
    if include_input:
        out_ref[t, :, :] = x.astype(odt)
        t += 1
    if fast_trig:
        # Log-sampled bands are exact powers of two -> double-angle recurrence:
        # sin(2a) = 2 s c, cos(2a) = 1 - 2 s^2.  One polynomial sin/cos eval,
        # then ~3 VPU mul/adds per extra octave.
        s = jnp.sin(x)
        c = jnp.cos(x)
        out_ref[t, :, :] = s.astype(odt)
        out_ref[t + 1, :, :] = c.astype(odt)
        t += 2
        for _ in range(len(freqs) - 1):
            s, c = 2.0 * s * c, 1.0 - 2.0 * s * s
            out_ref[t, :, :] = s.astype(odt)
            out_ref[t + 1, :, :] = c.astype(odt)
            t += 2
    else:
        for f in freqs:
            xf = x * f
            out_ref[t, :, :] = jnp.sin(xf).astype(odt)
            out_ref[t + 1, :, :] = jnp.cos(xf).astype(odt)
            t += 2


def positional_encode(x, n_freq, log_sampling=True, include_input=True, *,
                      tile_rows=512, out_dtype=None, fast_trig=False,
                      term_major=False, min_pallas_elems=65536):
    """PositionalEncoder.forward: (B, C) -> (B, C*(include_input + 2*n_freq)).

    tile_rows:        flat 128-elem rows per grid step (tunable; auto-capped so
                      the grid has enough steps for both v7x TensorCores).
    out_dtype:        output dtype (default: x.dtype). bf16 halves the binding
                      HBM write traffic when the consumer is a bf16 MLP.
    fast_trig:        double-angle recurrence (log_sampling only); ~1e-5-1e-4
                      deviation from exact sin/cos at small n_freq.
    term_major:       return the (n_terms, B, C) slab and skip the HBM relayout
                      that restores torch.cat's (B, n_terms*C) layout.
    min_pallas_elems: below this many elements, use the fused pure-jnp path.
    """
    assert x.ndim == 2, x.shape
    B, C = x.shape
    out_dtype = x.dtype if out_dtype is None else np.dtype(out_dtype)
    freqs = _freq_bands(n_freq, log_sampling)
    n_terms = (1 if include_input else 0) + 2 * n_freq
    out_nc = C * n_terms
    fast_trig = bool(fast_trig) and bool(log_sampling) and n_freq > 1
    n_flat = B * C

    # Small-input fallback: pallas_call launch + pad + relayout dwarf the work.
    if n_flat < min_pallas_elems:
        parts = _terms_jnp(x.astype(jnp.float32), freqs, include_input)
        if term_major:
            return jnp.stack(parts, axis=0).astype(out_dtype)
        return jnp.concatenate(parts, axis=-1).astype(out_dtype)

    # --- lane-dense flat layout (pad only to (8,128) granularity, guarded) ---
    rows = pl.cdiv(n_flat, _LANES)
    rows8 = _round_up(rows, _SUBLANES)
    pad = rows8 * _LANES - n_flat

    flat = x.reshape(-1)
    if pad:
        flat = jnp.pad(flat, (0, pad))
    flat = flat.reshape(rows8, _LANES)

    # Tile sizing: as big as requested (sublane-aligned, <= array), but capped
    # so medium inputs still produce >= ~8 grid steps (v7x has 2 TCs sharding
    # the "parallel" axis; 1-2 steps would idle half the chip).
    tile_r = max(_SUBLANES, min(_round_up(tile_rows, _SUBLANES), rows8))
    target_steps = 8
    if rows8 >= target_steps * _SUBLANES:
        tile_r = min(tile_r, _round_up(pl.cdiv(rows8, target_steps), _SUBLANES))
    grid = (pl.cdiv(rows8, tile_r),)  # ragged last block handled by Pallas

    kernel = functools.partial(
        _pos_enc_kernel, freqs=freqs, include_input=include_input,
        fast_trig=fast_trig)

    cost = pl.CostEstimate(
        flops=int(n_flat) * (6 * n_freq + 2),
        transcendentals=int(n_flat) * (2 if fast_trig else 2 * n_freq),
        bytes_accessed=int(n_flat) * int(np.dtype(x.dtype).itemsize)
        + int(n_flat) * n_terms * int(np.dtype(out_dtype).itemsize),
    )

    out_slab = pl.pallas_call(
        kernel,
        out_shape=jax.ShapeDtypeStruct((n_terms, rows8, _LANES), out_dtype),
        grid=grid,
        in_specs=[pl.BlockSpec((tile_r, _LANES), lambda i: (i, 0))],
        out_specs=pl.BlockSpec((n_terms, tile_r, _LANES), lambda i: (0, i, 0)),
        compiler_params=pltpu.CompilerParams(
            dimension_semantics=("parallel",),  # shards across both TCs on v7x
        ),
        cost_estimate=cost,
    )(flat)

    flat_out = out_slab.reshape(n_terms, rows8 * _LANES)
    if pad:
        flat_out = flat_out[:, :n_flat]
    tm = flat_out.reshape(n_terms, B, C)
    if term_major:
        # Consumers that fold the [x, sin, cos, ...] permutation into their
        # first weight matrix should take this slab and skip the relayout.
        return tm
    # TODO(synk): this transpose re-reads/re-writes the full output in HBM
    # (~2x end-to-end traffic) purely to match torch.cat's (B, n_terms*C)
    # layout; use term_major=True when the consumer allows it.
    return tm.transpose(1, 0, 2).reshape(B, out_nc)


if __name__ == "__main__":
    # Module config: in_nc=4, n_freq=4, log_sampling=True, include_input=True
    in_nc = 4
    n_freq = 4
    include_input = True
    expected_nc = in_nc * (2 * n_freq + (1 if include_input else 0))

    k1, k2, k3 = jax.random.split(jax.random.PRNGKey(0), 3)

    # Case 1: lane-dense Pallas path, no padding needed (4096*4 = 16*1024).
    B1 = 4096
    x1 = jax.random.normal(k1, (B1, in_nc), dtype=jnp.float32)
    out1 = jax.block_until_ready(
        positional_encode(x1, n_freq, include_input=include_input,
                          min_pallas_elems=0))
    ref1 = positional_encode_ref(x1, n_freq, include_input=include_input)
    assert out1.shape == (B1, expected_nc), out1.shape
    assert jnp.allclose(out1, ref1, atol=1e-5, rtol=1e-5), "case1 mismatch"

    # Case 2: ragged rows + guarded pad (1234*4 = 4936 elems -> 40 rows).
    B2 = 1234
    x2 = jax.random.normal(k2, (B2, in_nc), dtype=jnp.float32)
    out2 = jax.block_until_ready(
        positional_encode(x2, n_freq, include_input=include_input,
                          min_pallas_elems=0))
    ref2 = positional_encode_ref(x2, n_freq, include_input=include_input)
    assert out2.shape == (B2, expected_nc), out2.shape
    assert jnp.allclose(out2, ref2, atol=1e-5, rtol=1e-5), "case2 mismatch"

    # Case 3: double-angle recurrence (slightly looser tolerance).
    out3 = jax.block_until_ready(
        positional_encode(x1, n_freq, include_input=include_input,
                          fast_trig=True, min_pallas_elems=0))
    assert jnp.allclose(out3, ref1, atol=1e-4, rtol=1e-4), "case3 mismatch"

    # Case 4: bf16 output (halves HBM write traffic for bf16 consumers).
    out4 = jax.block_until_ready(
        positional_encode(x1, n_freq, include_input=include_input,
                          out_dtype=jnp.bfloat16, min_pallas_elems=0))
    assert out4.dtype == jnp.bfloat16
    assert jnp.allclose(out4.astype(jnp.float32), ref1, atol=5e-2, rtol=5e-2), \
        "case4 mismatch"

    # Case 5: tiny input uses the fused pure-jnp fallback.
    B5 = 16
    x5 = jax.random.normal(k3, (B5, in_nc), dtype=jnp.float32)
    out5 = jax.block_until_ready(
        positional_encode(x5, n_freq, include_input=include_input))
    ref5 = positional_encode_ref(x5, n_freq, include_input=include_input)
    assert out5.shape == (B5, expected_nc), out5.shape
    assert jnp.allclose(out5, ref5, atol=1e-5, rtol=1e-5), "case5 mismatch"

    print("KERNEL_OK")
</pallas_src>

<mosaic_0001>
module attributes {stable_mosaic.version = 11 : i64} {
  func.func @_pos_enc_kernel(%arg0: i32, %arg1: memref<16x128xf32, #tpu.memory_space<vmem>>, %arg2: memref<9x16x128xf32, #tpu.memory_space<vmem>>) attributes {dimension_semantics = [#tpu.dimension_semantics<parallel>], iteration_bounds = array<i64: 8>, scalar_prefetch = 0 : i64, scratch_operands = 0 : i64, tpu.core_type = #tpu.core_type<tc>, window_params = [{transform_indices = @transform_0, window_bounds = array<i64: 16, 128>}, {transform_indices = @transform_1, window_bounds = array<i64: 9, 16, 128>}]} {
    %c0 = arith.constant 0 : index
    %c0_0 = arith.constant 0 : index
    %0 = vector.load %arg1[%c0, %c0_0] : memref<16x128xf32, #tpu.memory_space<vmem>>, vector<16x128xf32>
    %c0_1 = arith.constant 0 : index
    %c0_2 = arith.constant 0 : index
    %c0_3 = arith.constant 0 : index
    %1 = vector.load %arg2[%c0_1, %c0_2, %c0_3] : memref<9x16x128xf32, #tpu.memory_space<vmem>>, vector<1x16x128xf32>
    %2 = vector.shape_cast %1 : vector<1x16x128xf32> to vector<16x128xf32>
    %3 = vector.shape_cast %0 : vector<16x128xf32> to vector<1x16x128xf32>
    tpu.vector_store %arg2[%c0_1, %c0_2, %c0_3], %3 {strides = array<i32>} : memref<9x16x128xf32, #tpu.memory_space<vmem>>, vector<1x16x128xf32>,
    %cst = arith.constant 1.000000e+00 : f32
    %4 = vector.broadcast %cst : f32 to vector<16x128xf32>
    %5 = arith.mulf %0, %4 : vector<16x128xf32>
    %6 = math.sin %5 : vector<16x128xf32>
    %c1 = arith.constant 1 : index
    %c0_4 = arith.constant 0 : index
    %c0_5 = arith.constant 0 : index
    %7 = vector.load %arg2[%c1, %c0_4, %c0_5] : memref<9x16x128xf32, #tpu.memory_space<vmem>>, vector<1x16x128xf32>
    %8 = vector.shape_cast %7 : vector<1x16x128xf32> to vector<16x128xf32>
    %9 = vector.shape_cast %6 : vector<16x128xf32> to vector<1x16x128xf32>
    tpu.vector_store %arg2[%c1, %c0_4, %c0_5], %9 {strides = array<i32>} : memref<9x16x128xf32, #tpu.memory_space<vmem>>, vector<1x16x128xf32>,
    %10 = math.cos %5 : vector<16x128xf32>
    %c2 = arith.constant 2 : index
    %c0_6 = arith.constant 0 : index
    %c0_7 = arith.constant 0 : index
    %11 = vector.load %arg2[%c2, %c0_6, %c0_7] : memref<9x16x128xf32, #tpu.memory_space<vmem>>, vector<1x16x128xf32>
    %12 = vector.shape_cast %11 : vector<1x16x128xf32> to vector<16x128xf32>
    %13 = vector.shape_cast %10 : vector<16x128xf32> to vector<1x16x128xf32>
    tpu.vector_store %arg2[%c2, %c0_6, %c0_7], %13 {strides = array<i32>} : memref<9x16x128xf32, #tpu.memory_space<vmem>>, vector<1x16x128xf32>,
    %cst_8 = arith.constant 2.000000e+00 : f32
    %14 = vector.broadcast %cst_8 : f32 to vector<16x128xf32>
    %15 = arith.mulf %0, %14 : vector<16x128xf32>
    %16 = math.sin %15 : vector<16x128xf32>
    %c3 = arith.constant 3 : index
    %c0_9 = arith.constant 0 : index
    %c0_10 = arith.constant 0 : index
    %17 = vector.load %arg2[%c3, %c0_9, %c0_10] : memref<9x16x128xf32, #tpu.memory_space<vmem>>, vector<1x16x128xf32>
    %18 = vector.shape_cast %17 : vector<1x16x128xf32> to vector<16x128xf32>
    %19 = vector.shape_cast %16 : vector<16x128xf32> to vector<1x16x128xf32>
    tpu.vector_store %arg2[%c3, %c0_9, %c0_10], %19 {strides = array<i32>} : memref<9x16x128xf32, #tpu.memory_space<vmem>>, vector<1x16x128xf32>,
    %20 = math.cos %15 : vector<16x128xf32>
    %c4 = arith.constant 4 : index
    %c0_11 = arith.constant 0 : index
    %c0_12 = arith.constant 0 : index
    %21 = vector.load %arg2[%c4, %c0_11, %c0_12] : memref<9x16x128xf32, #tpu.memory_space<vmem>>, vector<1x16x128xf32>
    %22 = vector.shape_cast %21 : vector<1x16x128xf32> to vector<16x128xf32>
    %23 = vector.shape_cast %20 : vector<16x128xf32> to vector<1x16x128xf32>
    tpu.vector_store %arg2[%c4, %c0_11, %c0_12], %23 {strides = array<i32>} : memref<9x16x128xf32, #tpu.memory_space<vmem>>, vector<1x16x128xf32>,
    %cst_13 = arith.constant 4.000000e+00 : f32
    %24 = vector.broadcast %cst_13 : f32 to vector<16x128xf32>
    %25 = arith.mulf %0, %24 : vector<16x128xf32>
    %26 = math.sin %25 : vector<16x128xf32>
    %c5 = arith.constant 5 : index
    %c0_14 = arith.constant 0 : index
    %c0_15 = arith.constant 0 : index
    %27 = vector.load %arg2[%c5, %c0_14, %c0_15] : memref<9x16x128xf32, #tpu.memory_space<vmem>>, vector<1x16x128xf32>
    %28 = vector.shape_cast %27 : vector<1x16x128xf32> to vector<16x128xf32>
    %29 = vector.shape_cast %26 : vector<16x128xf32> to vector<1x16x128xf32>
    tpu.vector_store %arg2[%c5, %c0_14, %c0_15], %29 {strides = array<i32>} : memref<9x16x128xf32, #tpu.memory_space<vmem>>, vector<1x16x128xf32>,
    %30 = math.cos %25 : vector<16x128xf32>
    %c6 = arith.constant 6 : index
    %c0_16 = arith.constant 0 : index
    %c0_17 = arith.constant 0 : index
    %31 = vector.load %arg2[%c6, %c0_16, %c0_17] : memref<9x16x128xf32, #tpu.memory_space<vmem>>, vector<1x16x128xf32>
    %32 = vector.shape_cast %31 : vector<1x16x128xf32> to vector<16x128xf32>
    %33 = vector.shape_cast %30 : vector<16x128xf32> to vector<1x16x128xf32>
    tpu.vector_store %arg2[%c6, %c0_16, %c0_17], %33 {strides = array<i32>} : memref<9x16x128xf32, #tpu.memory_space<vmem>>, vector<1x16x128xf32>,
    %cst_18 = arith.constant 8.000000e+00 : f32
    %34 = vector.broadcast %cst_18 : f32 to vector<16x128xf32>
    %35 = arith.mulf %0, %34 : vector<16x128xf32>
    %36 = math.sin %35 : vector<16x128xf32>
    %c7 = arith.constant 7 : index
    %c0_19 = arith.constant 0 : index
    %c0_20 = arith.constant 0 : index
    %37 = vector.load %arg2[%c7, %c0_19, %c0_20] : memref<9x16x128xf32, #tpu.memory_space<vmem>>, vector<1x16x128xf32>
    %38 = vector.shape_cast %37 : vector<1x16x128xf32> to vector<16x128xf32>
    %39 = vector.shape_cast %36 : vector<16x128xf32> to vector<1x16x128xf32>
    tpu.vector_store %arg2[%c7, %c0_19, %c0_20], %39 {strides = array<i32>} : memref<9x16x128xf32, #tpu.memory_space<vmem>>, vector<1x16x128xf32>,
    %40 = math.cos %35 : vector<16x128xf32>
    %c8 = arith.constant 8 : index
    %c0_21 = arith.constant 0 : index
    %c0_22 = arith.constant 0 : index
    %41 = vector.load %arg2[%c8, %c0_21, %c0_22] : memref<9x16x128xf32, #tpu.memory_space<vmem>>, vector<1x16x128xf32>
    %42 = vector.shape_cast %41 : vector<1x16x128xf32> to vector<16x128xf32>
    %43 = vector.shape_cast %40 : vector<16x128xf32> to vector<1x16x128xf32>
    tpu.vector_store %arg2[%c8, %c0_21, %c0_22], %43 {strides = array<i32>} : memref<9x16x128xf32, #tpu.memory_space<vmem>>, vector<1x16x128xf32>,
    return
  }
  func.func @transform_0(%arg0: i32) -> (i32, i32) {
    %c0_i32 = arith.constant 0 : i32
    %c0_i32_0 = arith.constant 0 : i32
    return %arg0, %c0_i32 : i32, i32
  }
  func.func @transform_1(%arg0: i32) -> (i32, i32, i32) {
    %c0_i32 = arith.constant 0 : i32
    %c0_i32_0 = arith.constant 0 : i32
    %c0_i32_1 = arith.constant 0 : i32
    return %c0_i32, %arg0, %c0_i32_0 : i32, i32, i32
  }
}

</mosaic_0001>

<bundles_post_ra>
// kernel: tpu_custom_call.1
= control target key start
LH: loop header
LB: loop body
LE: loop exit
PB: predicated region body
PF: predicated region fallthrough
CT: control target
= control target key end

     0   :  { %6 = vsyncpa [#allocation3], 0  ;;  %s4075_s0 = inlined_call_operand.hbm [shape: f32[128,128], index: 0, kind: input, shape index: {}]   ;;  %s4076_s1 = inlined_call_operand.hbm [shape: f32[9,128,128], index: 1, kind: output, shape index: {}]  }
   0x1   :  { %8 = vsyncpa [#allocation3 + $0x1], 0 }
   0x2   :  { %9 = vsyncpa [#allocation4], 0 }
   0x3   :  { %11 = vsyncpa [#allocation4 + $0x1], 0  ;;  %s3002_s6 = smov 0   ;;  %s3004_s7 = smov 0  }
   0x4   :  { %s3006_s8 = smov 0   ;;  %s3008_s9 = smov 0  }
   0x5 LB: > { %s3023_s10 = sadd.s32 4294967295, %s2974_s9   ;;  %s2757_s11 = sadd.s32 4294967294, %s2974_s9   ;;  %s2974_s9 = sphi %s3008_s9, %s4097_s9   ;;  %s2970_s8 = sphi %s3006_s8, %s4096_s8   ;;  %s2966_s7 = sphi %s3004_s7, %s4095_s7   ;;  %s2962_s6 = sphi %s3002_s6, %s4094_s6  }
   0x6   : > { %s3027_s12 = sadd.s32 1, %s2974_s9   ;;  %s24_s13 = sadd.s32 1, %s2970_s8 }
   0x7   : > { %s21_s14 = ssub.s32 %s2974_s9, %s3027_s12  ;;  %p31_p0 = scmp.ne.s32.totalorder %s2970_s8, %s2966_s7 }
   0x8   : > { %p22_p1 = scmp.eq.s32.totalorder %s21_s14, 0  ;;  %p32_p2 = scmp.eq.s32.totalorder %s2974_s9, 0 }
   0x9   : > { %p37_p3 = scmp.ne.s32.totalorder %s2966_s7, %s2962_s6  ;;  %p38_p4 = scmp.eq.s32.totalorder %s3023_s10, 0 }
   0xa   : > { %s3039_s15 = scalar_select %p22_p1, %s2970_s8, %s24_s13  }
   0xb   : > { %p3041_p5 = por %p32_p2, %p31_p0  ;;  %p3045_p6 = por %p38_p4, %p37_p3 }
   0xc   : > { %p61_p7 = scmp.eq.s32.totalorder %s3023_s10, 7  ;;  %p67_p8 = scmp.eq.s32.totalorder %s2757_s11, 7 }
   0xd   : > { %p2854_p9 = scmp.lt.s32.totalorder %s2974_s9, 8  ;;  %s87_s20 = sand.u32 1, %s2970_s8  }
   0xe   : > { %p3051_p10 = por %p61_p7, %p31_p0  ;;  %p3055_p11 = por %p67_p8, %p37_p3 }
   0xf   : > { %s2833_s21 = sshll.u32 %s2974_s9, 4  ;;  %s2760_s22 = sshll.u32 %s87_s20, 4 }
  0x10   : > { %s96_s25 = scalar_lea.hbm %s4075_s0, %s2833_s21  ;;  %s91_s27 = scalar_lea.vmem [#allocation2], %s2760_s22 }
  0x11   : > { %s97_s26 = sshll.u32 %s96_s25, 4  ;;  %s99_s28 = sshll.u32 %s91_s27, 4  ;;  %s98_s26 = int_to_ptr.hbm [resolvable:$true] %s97_s26  ;;  %s100_s28 = int_to_ptr.vmem [resolvable:$true] %s99_s28 }
  0x12   : > { %p3066_p12 = pnand %p2854_p9, %p3041_p5  ;;  %p2763_p13 = scmp.ge.s32.totalorder %s2974_s9, 1 }
  0x13   : > { %p107_p0 = scmp.lt.s32.totalorder %s2974_s9, 9  ;;  %s88_s30 = scalar_lea.sflag [#allocation3], %s87_s20 }
  0x14   : > { %s2906_s2 = sshra.s32 %s98_s26, 4  ;;  %p2910_p2 = pneg %p3066_p12  ;;  %s2907_s2 = int_to_ptr.hbm [resolvable:$true] %s2906_s2 }
  0x15   : > { %s2908_s3 = scalar_lea.hbm %s2907_s2, 16  ;;  %s2913_s11 = scalar_lea.hbm %s4075_s0, 128 }
  0x16   : > { %p2909_p1 = scmp.ne.s32.totalorder %s2907_s2, %s2908_s3  ;;  %p2914_p5 = scmp.lt.s32.totalorder %s2907_s2, %s4075_s0 }
  0x17   : > { %p2915_p7 = scmp.lt.s32.totalorder %s2913_s11, %s2908_s3 }
  0x18   : > { %p2911_p3 = pnand %p2910_p2, %p2909_p1 }
  0x19   : > { %p2916_p8 = por %p2915_p7, %p2914_p5 }
  0x1a   : > { %p2912_p4 = pneg %p2911_p3 }
  0x1c   : > { %p2917_p9 = pnand %p2916_p8, %p2912_p4 }
  0x1e   : > { %2920 = shalt.err (!%p2917_p9)
}
  0x1f   : > { %s2976_s16 = smov 128   ;;  %s2977_s20 = smov 8  }
  0x20   : > { %2849 = dma.hbm_to_vmem [thread:$0]  (!%p3066_p12), %s98_s26, 256, %s100_s28, %s88_s30, %s2976_s16, %s2976_s16, %s2977_s20  }
  0x21   : > { %p108_p1 = pnand %p2763_p13, %p107_p0 }
  0x22   : > { %s3087_s21 = sand.u32 (!%p108_p1), 1, %s2966_s7  }
  0x23   : > { %111 = sbr.rel (%p108_p1) target bundleno = 407 (0x197), region = 24  ;;  %s2764_s22 = sshll.u32 (!%p108_p1), %s3087_s21, 4 }
  0x24   : > { %s114_s23 = scalar_lea.sflag (!%p108_p1), [#allocation3], %s3087_s21  ;;  %s117_s24 = scalar_lea.vmem (!%p108_p1), [#allocation2], %s2764_s22 }
  0x28   : > { %2953 = dma.done.wait (%p3045_p6), %s114_s23, 256  }
  0x29   : > { %2955 = vsyncadd (%p3045_p6), %s114_s23, 4294967040  ;;  %s2835_s25 = smul.u32 144, %s3087_s21  ;;  %v3096_v0 = vld [vmem:[%s117_s24] sm:$0xff]  ;;  %v3098_v1 = vld [vmem:[%s117_s24 + $0x8] sm:$0xff]  ;;  %v2978_v27 = vmov 683565275  }
  0x2a   : > { %v143_v2 = vand.u32 2147483647, %v3096_v0  ;;  %v146_v3 = vand.u32 2139095040, %v3096_v0  ;;  %v298_v4 = vand.u32 2147483647, %v3098_v1  ;;  %v301_v5 = vand.u32 2139095040, %v3098_v1 }
  0x2b   : > { %s3100_s26 = scalar_lea.vmem [#allocation5], %s2835_s25  ;;  %v3111_v6 = vmul.f32 2.0, %v3096_v0  ;;  %v2979_v29 = vmov 2475754826   ;;  %v2980_v31 = vmov 2131351028  }
  0x2c   : > { %141 = vst [vmem:[%s3100_s26] sm:$0xff] %v3096_v0  ;;  %v147_v7 = vshrl.u32 %v146_v3, 23  ;;  %v150_v8 = vand.u32 8388607, %v143_v2  ;;  %v302_v9 = vshrl.u32 %v301_v5, 23  ;;  %v305_v10 = vand.u32 8388607, %v298_v4 }
  0x2d   : > { %142 = vst [vmem:[%s3100_s26 + $0x8] sm:$0xff] %v3098_v1  ;;  %v772_v14 = vand.u32 2139095040, %v3111_v6  ;;  %v2981_v33 = vmov 2102212464   ;;  %v2982_v35 = vmov 920167782  }
  0x2e   : > { %v2765_v11 = vadd.s32 4294967169, %v147_v7  ;;  %v151_v12 = vor.u32 8388608, %v150_v8  ;;  %v2768_v13 = vadd.s32 4294967169, %v302_v9  ;;  %v306_v16 = vor.u32 8388608, %v305_v10  ;;  %s2646_s17 = scalar_lea.sflag [#allocation4], %s3087_s21 }
  0x2f   : > { %v773_v20 = vshrl.u32 %v772_v14, 23  ;;  %v2983_v44 = vmov 1326507024  }
  0x30   : > { %v153_v15 = vadd.s32 1, %v2765_v11  ;;  %v308_v17 = vadd.s32 1, %v2768_v13  ;;  %v3118_v19 = vshll.u32 %v151_v12, 8  ;;  %v3124_v25 = vshll.u32 %v306_v16, 8 }
  0x31   : > { %v3132_v38 = vadd.s32 4294967169, %v773_v20 }
  0x32   : > { %vm154_vm0 = vcmp.gt.s32.totalorder %v153_v15, 0  ;;  %vm309_vm1 = vcmp.gt.s32.totalorder %v308_v17, 0  ;;  %v192_v37 = vand.u32 65535, %v3118_v19  ;;  %v193_v42 = vshrl.u32 %v3118_v19, 16 }
  0x33   : > { %v155_v18 = vsel %vm154_vm0, %v153_v15, 0  ;;  %v310_v22 = vsel %vm309_vm1, %v308_v17, 0 }
  0x34   : > { %v157_v21 = vand.u32 31, %v155_v18  ;;  %v3120_v23 = vshrl.u32 %v155_v18, 5  ;;  %v3122_v24 = vand.u32 31, %v310_v22  ;;  %v3152_v55 = vshrl.u32 %v310_v22, 5 }
  0x36   : > { %v158_v26 = vsub.s32 32, %v157_v21  ;;  %v160_v28 = vshll.u32 %v2978_v27, %v157_v21  ;;  %v163_v30 = vshll.u32 %v2979_v29, %v157_v21  ;;  %v166_v32 = vshll.u32 %v2980_v31, %v157_v21 }
  0x37   : > { %v169_v34 = vshll.u32 %v2981_v33, %v157_v21  ;;  %v172_v36 = vshll.u32 %v2982_v35, %v157_v21  ;;  %vm175_vm2 = vcmp.lt.s32.totalorder %v3120_v23, 1  ;;  %vm178_vm3 = vcmp.lt.s32.totalorder %v3120_v23, 4 }
  0x38   : > { %v161_v39 = vshrl.u32 %v2979_v29, %v158_v26  ;;  %v164_v40 = vshrl.u32 %v2980_v31, %v158_v26  ;;  %v167_v41 = vshrl.u32 %v2981_v33, %v158_v26  ;;  %v170_v43 = vshrl.u32 %v2982_v35, %v158_v26 }
  0x39   : > { %v173_v45 = vshrl.u32 %v2983_v44, %v158_v26  ;;  %v3143_v49 = vsub.s32 32, %v3122_v24  ;;  %v159_v50 = vshrl.u32 %v2978_v27, %v158_v26  ;;  %vm177_vm4 = vcmp.lt.s32.totalorder %v3120_v23, 3 }
  0x3a   : > { %v162_v46 = vor.u32 %v161_v39, %v160_v28  ;;  %v165_v47 = vor.u32 %v164_v40, %v163_v30  ;;  %v168_v48 = vor.u32 %v167_v41, %v166_v32  ;;  %v171_v51 = vor.u32 %v170_v43, %v169_v34 }
  0x3b   : > { %v174_v52 = vor.u32 %v173_v45, %v172_v36  ;;  %vm176_vm5 = vcmp.lt.s32.totalorder %v3120_v23, 2  ;;  %v315_v58 = vshll.u32 %v2978_v27, %v3122_v24  ;;  %v318_v59 = vshll.u32 %v2979_v29, %v3122_v24 }
  0x3c   : > { %v183_v53 = vsel %vm175_vm2, %v162_v46, %v165_v47  ;;  %v187_v54 = vsel %vm175_vm2, %v165_v47, %v168_v48  ;;  %v184_v56 = vsel %vm178_vm3, %v171_v51, 920167782  ;;  %v180_v60 = vsel %vm178_vm3, %v168_v48, 2102212464 }
  0x3d   : > { %v188_v57 = vsel %vm178_vm3, %v174_v52, 1326507024  ;;  %v185_v61 = vsel %vm177_vm4, %v168_v48, %v184_v56  ;;  %v316_v63 = vshrl.u32 %v2979_v29, %v3143_v49  ;;  %v179_v3 = vsel %vm175_vm2, %v159_v50, %v162_v46 }
  0x3e   : > { %v189_v62 = vsel %vm177_vm4, %v171_v51, %v188_v57  ;;  %v186_v5 = vsel %vm176_vm5, %v183_v53, %v185_v61  ;;  %v319_v8 = vshrl.u32 %v2980_v31, %v3143_v49  ;;  %v181_v13 = vsel %vm177_vm4, %v165_v47, %v180_v60 }
  0x3f   : > { %v190_v7 = vsel %vm176_vm5, %v187_v54, %v189_v62  ;;  %v216_v11 = vand.u32 65535, %v186_v5  ;;  %v217_v12 = vshrl.u32 %v186_v5, 16  ;;  %v3180_v14 = vor.u32 %v316_v63, %v315_v58 }
  0x40   : > { %v194_v9 = vand.u32 65535, %v190_v7  ;;  %v195_v10 = vshrl.u32 %v190_v7, 16  ;;  %v3182_v15 = vor.u32 %v319_v8, %v318_v59  ;;  %v321_v16 = vshll.u32 %v2980_v31, %v3122_v24 }
  0x41   : > { %v322_v21 = vshrl.u32 %v2981_v33, %v3143_v49  ;;  %v218_v26 = vmul.u32 %v216_v11, %v192_v37  ;;  %v219_v28 = vmul.u32 %v217_v12, %v192_v37  ;;  %v220_v30 = vmul.u32 %v216_v11, %v193_v42 }
  0x42   : > { %v196_v17 = vmul.u32 %v194_v9, %v192_v37  ;;  %v197_v18 = vmul.u32 %v195_v10, %v192_v37  ;;  %v198_v20 = vmul.u32 %v194_v9, %v193_v42  ;;  %v199_v22 = vmul.u32 %v195_v10, %v193_v42 }
  0x43   : > { %v221_v39 = vmul.u32 %v217_v12, %v193_v42  ;;  %v222_v41 = vshll.u32 %v219_v28, 16  ;;  %v223_v43 = vshrl.u32 %v219_v28, 16  ;;  %v224_v45 = vshll.u32 %v220_v30, 16 }
  0x44   : > { %v200_v32 = vshll.u32 %v197_v18, 16  ;;  %v201_v34 = vshrl.u32 %v197_v18, 16  ;;  %v202_v36 = vshll.u32 %v198_v20, 16  ;;  %v203_v40 = vshrl.u32 %v198_v20, 16 }
  0x45   : > { %v225_v47 = vshrl.u32 %v220_v30, 16  ;;  %v324_v48 = vshll.u32 %v2981_v33, %v3122_v24  ;;  %v2984_v50 = vmov 0   ;;  %vm226_vm7 = vc.u32 %v218_v26, %v222_v41 }
  0x46   : > { %vm204_vm6 = vc.u32 %v196_v17, %v200_v32  ;;  %v206_v46 = vadd.s32 %v200_v32, %v196_v17  ;;  %v228_v37 = vadd.s32 %v222_v41, %v218_v26  ;;  %v325_v52 = vshrl.u32 %v2982_v35, %v3143_v49 }
  0x47   : > { %v205_v51 = vsel %vm204_vm6, 1, %v2984_v50  ;;  %v227_v42 = vsel %vm226_vm7, 1, %v2984_v50  ;;  %v327_v54 = vshll.u32 %v2982_v35, %v3122_v24  ;;  %v323_v58 = vor.u32 %v322_v21, %v321_v16 }
  0x48   : > { %v207_v53 = vadd.s32 %v205_v51, %v199_v22  ;;  %vm208_vm8 = vc.u32 %v206_v46, %v202_v36  ;;  %v229_v57 = vadd.s32 %v227_v42, %v221_v39  ;;  %vm230_vm9 = vc.u32 %v228_v37, %v224_v45 }
  0x49   : > { %v209_v56 = vsel %vm208_vm8, 1, %v2984_v50  ;;  %v231_v60 = vsel %vm230_vm9, 1, %v2984_v50  ;;  %v326_v61 = vor.u32 %v325_v52, %v324_v48  ;;  %v328_v62 = vshrl.u32 %v2983_v44, %v3143_v49 }
  0x4a   : > { %v211_v59 = vadd.s32 %v209_v56, %v207_v53  ;;  %v3200_v63 = vadd.s32 %v228_v37, %v224_v45  ;;  %v233_v5 = vadd.s32 %v231_v60, %v229_v57  ;;  %vm330_vm10 = vcmp.lt.s32.totalorder %v3152_v55, 1 }
  0x4b   : > { %vm332_vm11 = vcmp.lt.s32.totalorder %v3152_v55, 3  ;;  %v329_v7 = vor.u32 %v328_v62, %v327_v54  ;;  %vm331_vm12 = vcmp.lt.s32.totalorder %v3152_v55, 2  ;;  %vm333_vm13 = vcmp.lt.s32.totalorder %v3152_v55, 4 }
  0x4c   : > { %v212_v24 = vadd.s32 %v211_v59, %v201_v34  ;;  %v182_v8 = vsel %vm176_vm5, %v179_v3, %v181_v13  ;;  %v234_v9 = vadd.s32 %v233_v5, %v223_v43  ;;  %v338_v10 = vsel %vm330_vm10, %v3180_v14, %v3182_v15 }
  0x4d   : > { %v339_v11 = vsel %vm333_vm13, %v326_v61, 920167782  ;;  %v342_v17 = vsel %vm330_vm10, %v3182_v15, %v323_v58  ;;  %v347_v23 = vand.u32 65535, %v3124_v25  ;;  %v343_v18 = vsel %vm333_vm13, %v329_v7, 1326507024 }
  0x4e   : > { %v3214_v12 = vadd.s32 %v212_v24, %v203_v40  ;;  %v340_v16 = vsel %vm332_vm11, %v323_v58, %v339_v11  ;;  %v235_v3 = vadd.s32 %v234_v9, %v225_v47  ;;  %v348_v20 = vshrl.u32 %v3124_v25, 16 }
  0x4f   : > { %v341_v13 = vsel %vm331_vm12, %v338_v10, %v340_v16  ;;  %v236_v21 = vmul.u32 %v3118_v19, %v182_v8  ;;  %v344_v22 = vsel %vm332_vm11, %v326_v61, %v343_v18  ;;  %v314_v30 = vshrl.u32 %v2978_v27, %v3143_v49 }
  0x50   : > { %vm238_vm14 = vc.u32 %v3214_v12, %v3200_v63  ;;  %v371_v26 = vand.u32 65535, %v341_v13  ;;  %v239_v28 = vadd.s32 1, %v235_v3  ;;  %v345_v32 = vsel %vm331_vm12, %v342_v17, %v344_v22 }
  0x51   : > { %v372_v34 = vshrl.u32 %v341_v13, 16  ;;  %v349_v36 = vand.u32 65535, %v345_v32  ;;  %v350_v39 = vshrl.u32 %v345_v32, 16  ;;  %v779_v40 = vadd.s32 1, %v3132_v38 }
  0x52   : > { %v240_v19 = vsel %vm238_vm14, %v239_v28, %v235_v3  ;;  %v335_v41 = vsel %vm333_vm13, %v323_v58, 2102212464  ;;  %v375_v45 = vmul.u32 %v371_v26, %v348_v20  ;;  %v373_v51 = vmul.u32 %v371_v26, %v347_v23 }
  0x53   : > { %v374_v43 = vmul.u32 %v372_v34, %v347_v23  ;;  %v241_v46 = vadd.s32 %v240_v19, %v236_v21  ;;  %v351_v47 = vmul.u32 %v349_v36, %v347_v23  ;;  %v352_v48 = vmul.u32 %v350_v39, %v347_v23 }
  0x54   : > { %v334_v49 = vsel %vm330_vm10, %v314_v30, %v3180_v14  ;;  %v353_v37 = vmul.u32 %v349_v36, %v348_v20  ;;  %v336_v38 = vsel %vm332_vm11, %v3182_v15, %v335_v41  ;;  %v354_v42 = vmul.u32 %v350_v39, %v348_v20 }
  0x55   : > { %v377_v52 = vshll.u32 %v374_v43, 16  ;;  %v242_v53 = vadd.s32 536870912, %v241_v46  ;;  %v355_v54 = vshll.u32 %v352_v48, 16  ;;  %v376_v57 = vmul.u32 %v372_v34, %v348_v20 }
  0x56   : > { %v357_v56 = vshll.u32 %v353_v37, 16  ;;  %v379_v58 = vshll.u32 %v375_v45, 16  ;;  %vm780_vm15 = vcmp.gt.s32.totalorder %v779_v40, 0  ;;  %v356_v61 = vshrl.u32 %v352_v48, 16 }
  0x57   : > { %v243_v59 = vshrl.u32 %v242_v53, 30  ;;  %vm359_vm0 = vc.u32 %v351_v47, %v355_v54  ;;  %v361_v60 = vadd.s32 %v355_v54, %v351_v47  ;;  %vm381_vm1 = vc.u32 %v373_v51, %v377_v52 }
  0x58   : > { %v360_v14 = vsel %vm359_vm0, 1, %v2984_v50  ;;  %v382_v62 = vsel %vm381_vm1, 1, %v2984_v50  ;;  %v383_v5 = vadd.s32 %v377_v52, %v373_v51  ;;  %v781_v15 = vsel %vm780_vm15, %v779_v40, 0 }
  0x59   : > { %v244_v24 = vshll.u32 %v243_v59, 30  ;;  %v362_v7 = vadd.s32 %v360_v14, %v354_v42  ;;  %vm363_vm2 = vc.u32 %v361_v60, %v357_v56  ;;  %v378_v9 = vshrl.u32 %v374_v43, 16 }
  0x5a   : > { %v364_v8 = vsel %vm363_vm2, 1, %v2984_v50  ;;  %v384_v10 = vadd.s32 %v382_v62, %v376_v57  ;;  %vm385_vm3 = vc.u32 %v383_v5, %v379_v58  ;;  %v358_v16 = vshrl.u32 %v353_v37, 16 }
  0x5b   : > { %v245_v11 = vsub.s32 %v241_v46, %v244_v24  ;;  %v366_v17 = vadd.s32 %v364_v8, %v362_v7  ;;  %v386_v23 = vsel %vm385_vm3, 1, %v2984_v50  ;;  %v380_v3 = vshrl.u32 %v375_v45, 16 }
  0x5c   : > { %v388_v13 = vadd.s32 %v386_v23, %v384_v10  ;;  %v769_v18 = vand.u32 2147483647, %v3111_v6  ;;  %v783_v20 = vand.u32 31, %v781_v15  ;;  %v3250_v26 = vadd.s32 %v383_v5, %v379_v58 }
  0x5d   : > { %vm246_vm4 = vcmp.lt.s32.totalorder %v245_v11, 0  ;;  %v247_v21 = vsub.s32 0, %v245_v11  ;;  %v367_v22 = vadd.s32 %v366_v17, %v356_v61  ;;  %v337_v28 = vsel %vm331_vm12, %v334_v49, %v336_v38 }
  0x5e   : > { %v389_v30 = vadd.s32 %v388_v13, %v378_v9  ;;  %vm145_vm5 = vcmp.lt.s32.totalorder %v3096_v0, 0  ;;  %v784_v40 = vsub.s32 32, %v783_v20  ;;  %v237_v19 = vadd.s32 %v3200_v63, %v3214_v12 }
  0x5f   : > { %v248_v32 = vsel %vm246_vm4, %v247_v21, %v245_v11  ;;  %v3254_v34 = vadd.s32 %v367_v22, %v358_v16  ;;  %v391_v41 = vmul.u32 %v3124_v25, %v337_v28  ;;  %v776_v55 = vand.u32 8388607, %v769_v18 }
  0x60   : > { %v249_v36 = vclz %v248_v32  ;;  %v390_v39 = vadd.s32 %v389_v30, %v380_v3  ;;  %vm3266_vm7 = vcmp.le.f32.partialorder %v143_v2, 0.7853982  ;;  %v267_v46 = vsub.s32 4, %v243_v59 }
  0x61   : > { %vm393_vm6 = vc.u32 %v3254_v34, %v3250_v26  ;;  %v3270_v48 = vshrl.u32 %v781_v15, 5  ;;  %v786_v63 = vshll.u32 %v2978_v27, %v783_v20  ;;  %v789_v25 = vshll.u32 %v2979_v29, %v783_v20 }
  0x62   : > { %v2766_v45 = vadd.s32 4294967294, %v249_v36  ;;  %v394_v47 = vadd.s32 1, %v390_v39  ;;  %v792_v12 = vshll.u32 %v2980_v31, %v783_v20  ;;  %v795_v51 = vshll.u32 %v2981_v33, %v783_v20 }
  0x63   : > { %v787_v2 = vshrl.u32 %v2979_v29, %v784_v40  ;;  %v796_v37 = vshrl.u32 %v2982_v35, %v784_v40  ;;  %v790_v38 = vshrl.u32 %v2980_v31, %v784_v40  ;;  %v793_v42 = vshrl.u32 %v2981_v33, %v784_v40 }
  0x64   : > { %vm2767_vm8 = vcmp.lt.s32.totalorder %v2766_v45, 0  ;;  %v395_v49 = vsel %vm393_vm6, %v394_v47, %v390_v39  ;;  %v777_v58 = vor.u32 8388608, %v776_v55  ;;  %v268_v60 = vsel %vm145_vm5, %v267_v46, %v243_v59 }
  0x65   : > { %v252_v52 = vsel %vm2767_vm8, 0, %v2766_v45  ;;  %v396_v53 = vadd.s32 %v395_v49, %v391_v41  ;;  %v798_v14 = vshll.u32 %v2982_v35, %v783_v20  ;;  %v799_v62 = vshrl.u32 %v2983_v44, %v784_v40 }
  0x66   : > { %v253_v54 = vsub.s32 32, %v252_v52  ;;  %v254_v56 = vshll.u32 %v245_v11, %v252_v52  ;;  %v257_v57 = vsub.s32 4294967266, %v252_v52  ;;  %v788_v7 = vor.u32 %v787_v2, %v786_v63 }
  0x67   : > { %v397_v61 = vadd.s32 536870912, %v396_v53  ;;  %v797_v15 = vor.u32 %v796_v37, %v795_v51  ;;  %v791_v9 = vor.u32 %v790_v38, %v789_v25  ;;  %v794_v10 = vor.u32 %v793_v42, %v792_v12 }
  0x68   : > { %v255_v5 = vshrl.u32 %v237_v19, %v253_v54  ;;  %v258_v24 = vadd.s32 127, %v257_v57  ;;  %vm801_vm9 = vcmp.lt.s32.totalorder %v3270_v48, 1  ;;  %vm803_vm10 = vcmp.lt.s32.totalorder %v3270_v48, 3 }
  0x69   : > { %v398_v8 = vshrl.u32 %v397_v61, 30  ;;  %vm804_vm11 = vcmp.lt.s32.totalorder %v3270_v48, 4  ;;  %v3289_v59 = vsel %vm3266_vm7, 0, %v268_v60  ;;  %v3292_v23 = vmul.f32 2.0, %v3098_v1 }
  0x6a   : > { %v256_v11 = vor.u32 %v255_v5, %v254_v56  ;;  %v259_v16 = vshll.u32 %v258_v24, 23  ;;  %v800_v3 = vor.u32 %v799_v62, %v798_v14  ;;  %v785_v21 = vshrl.u32 %v2978_v27, %v784_v40 }
  0x6b   : > { %v399_v17 = vshll.u32 %v398_v8, 30  ;;  %v810_v22 = vsel %vm804_vm11, %v797_v15, 920167782  ;;  %vm802_vm12 = vcmp.lt.s32.totalorder %v3270_v48, 2  ;;  %v809_v30 = vsel %vm801_vm9, %v788_v7, %v791_v9 }
  0x6c   : > { %v260_v13 = vor.u32 4788187, %v259_v16  ;;  %v263_v20 = vcvt.s32.f32 %v256_v11  ;;  %v811_v32 = vsel %vm803_vm10, %v794_v10, %v810_v22  ;;  %v422_v39 = vsub.s32 4, %v398_v8 }
  0x6d   : > { %v3297_v28 = vsub.s32 %v396_v53, %v399_v17  ;;  %v813_v19 = vsel %vm801_vm9, %v791_v9, %v794_v10  ;;  %v3306_v41 = vshll.u32 %v777_v58, 8  ;;  %v806_v55 = vsel %vm804_vm11, %v794_v10, 2102212464 }
  0x6e   : > { %v261_v36 = vand.u32 2147483647, %v260_v13  ;;  %v814_v45 = vsel %vm804_vm11, %v800_v3, 1326507024  ;;  %vm300_vm14 = vcmp.lt.s32.totalorder %v3098_v1, 0  ;;  %v812_v47 = vsel %vm802_vm12, %v809_v30, %v811_v32 }
  0x6f   : > { %vm401_vm13 = vcmp.lt.s32.totalorder %v3297_v28, 0  ;;  %v402_v40 = vsub.s32 0, %v3297_v28  ;;  %v815_v63 = vsel %vm803_vm10, %v797_v15, %v814_v45  ;;  %v287_v25 = vadd.s32 3, %v3289_v59 }
  0x70   : > { %v264_v46 = vmul.f32 %v263_v20, %v261_v36  ;;  %v805_v51 = vsel %vm801_vm9, %v785_v21, %v788_v7  ;;  %v816_v49 = vsel %vm802_vm12, %v813_v19, %v815_v63  ;;  %v423_v52 = vsel %vm300_vm14, %v422_v39, %v398_v8 }
  0x71   : > { %v403_v12 = vsel %vm401_vm13, %v402_v40, %v3297_v28  ;;  %v807_v53 = vsel %vm803_vm10, %v791_v9, %v806_v55  ;;  %v818_v38 = vand.u32 65535, %v3306_v41  ;;  %v821_v42 = vshrl.u32 %v816_v49, 16 }
  0x72   : > { %v265_v2 = vxor.u32 2147483648, %v264_v46  ;;  %v404_v37 = vclz %v403_v12  ;;  %v842_v54 = vand.u32 65535, %v812_v47  ;;  %v843_v56 = vshrl.u32 %v812_v47, 16 }
  0x73   : > { %vm3334_vm15 = vcmp.le.f32.partialorder %v298_v4, 0.7853982  ;;  %v392_v60 = vadd.s32 %v3250_v26, %v3254_v34  ;;  %v3345_v62 = vand.u32 3, %v287_v25  ;;  %v819_v5 = vshrl.u32 %v3306_v41, 16 }
  0x74   : > { %v266_v57 = vsel %vm145_vm5, %v265_v2, %v264_v46  ;;  %v2769_v61 = vadd.s32 4294967294, %v404_v37  ;;  %v820_v24 = vand.u32 65535, %v816_v49  ;;  %v3352_v7 = vsel %vm3334_vm15, 0, %v423_v52 }
  0x75   : > { %v3343_v14 = vsel %vm3266_vm7, %v3096_v0, %v266_v57  ;;  %v3356_v26 = vsel %vm802_vm12, %v805_v51, %v807_v53  ;;  %v823_v43 = vmul.u32 %v821_v42, %v818_v38  ;;  %v844_v15 = vmul.u32 %v842_v54, %v818_v38 }
  0x76   : > { %v271_v4 = vmul.f32 %v3343_v14, %v3343_v14  ;;  %vm2770_vm0 = vcmp.lt.s32.totalorder %v2769_v61, 0  ;;  %v3358_v8 = vmul.u32 %v843_v56, %v818_v38  ;;  %v824_v3 = vmul.u32 %v820_v24, %v819_v5 }
  0x77   : > { %v407_v34 = vsel %vm2770_vm0, 0, %v2769_v61  ;;  %v3361_v13 = vmul.u32 %v842_v54, %v819_v5  ;;  %v847_v20 = vmul.u32 %v843_v56, %v819_v5  ;;  %v3364_v30 = vand.u32 3, %v3289_v59 }
  0x78   : > { %v272_v9 = vmul.f32 -0.001358992, %v271_v4  ;;  %v279_v10 = vmul.f32 -0.00019511016, %v271_v4  ;;  %v408_v11 = vsub.s32 32, %v407_v34  ;;  %v409_v16 = vshll.u32 %v3297_v28, %v407_v34 }
  0x79   : > { %v412_v17 = vsub.s32 4294967266, %v407_v34  ;;  %vm293_vm1 = vcmp.eq.s32.totalorder %v3345_v62, 2  ;;  %v822_v36 = vmul.u32 %v820_v24, %v818_v38  ;;  %v825_v39 = vmul.u32 %v821_v42, %v819_v5 }
  0x7a   : > { %v273_v21 = vadd.f32 0.041655596, %v272_v9  ;;  %v280_v22 = vadd.f32 0.008332121, %v279_v10  ;;  %v410_v48 = vshrl.u32 %v392_v60, %v408_v11  ;;  %v826_v19 = vshll.u32 %v823_v43, 16 }
  0x7b   : > { %v413_v32 = vadd.s32 127, %v412_v17  ;;  %v848_v45 = vshll.u32 %v3358_v8, 16  ;;  %vm290_vm2 = vcmp.eq.s32.totalorder %v3345_v62, 0  ;;  %v827_v47 = vshrl.u32 %v823_v43, 16 }
  0x7c   : > { %v274_v40 = vmul.f32 %v273_v21, %v271_v4  ;;  %v281_v55 = vmul.f32 %v280_v22, %v271_v4  ;;  %v411_v28 = vor.u32 %v410_v48, %v409_v16  ;;  %v828_v63 = vshll.u32 %v824_v3, 16 }
  0x7d   : > { %v414_v46 = vshll.u32 %v413_v32, 23  ;;  %v829_v25 = vshrl.u32 %v824_v3, 16  ;;  %vm289_vm3 = vcmp.lt.s32.totalorder %v3345_v62, 2  ;;  %vm601_vm4 = vcmp.lt.s32.totalorder %v3364_v30, 2 }
  0x7e   : > { %v275_v12 = vadd.f32 -0.4999988, %v274_v40  ;;  %v282_v59 = vadd.f32 -0.16666654, %v281_v55  ;;  %vm602_vm5 = vcmp.eq.s32.totalorder %v3364_v30, 0  ;;  %vm286_vm6 = vweird.f32 %v3096_v0 }
  0x7f   : > { %v415_v51 = vor.u32 4788187, %v414_v46  ;;  %v418_v49 = vcvt.s32.f32 %v411_v28  ;;  %vm830_vm7 = vc.u32 %v822_v36, %v826_v19  ;;  %v832_v2 = vadd.s32 %v826_v19, %v822_v36 }
  0x80   : > { %v276_v37 = vmul.f32 %v275_v12, %v271_v4  ;;  %v283_v52 = vmul.f32 %v282_v59, %v271_v4  ;;  %vm605_vm8 = vcmp.eq.s32.totalorder %v3364_v30, 2  ;;  %v831_v53 = vsel %vm830_vm7, 1, %v2984_v50 }
  0x81   : > { %v416_v38 = vand.u32 2147483647, %v415_v51  ;;  %v833_v42 = vadd.s32 %v831_v53, %v825_v39  ;;  %vm834_vm9 = vc.u32 %v832_v2, %v828_v63  ;;  %v850_v54 = vshll.u32 %v3361_v13, 16 }
  0x82   : > { %v277_v56 = vadd.f32 1.0, %v276_v37  ;;  %v284_v57 = vadd.f32 1.0, %v283_v52  ;;  %v835_v60 = vsel %vm834_vm9, 1, %v2984_v50  ;;  %v849_v61 = vshrl.u32 %v3358_v8, 16 }
  0x83   : > { %v419_v5 = vmul.f32 %v418_v49, %v416_v38  ;;  %v837_v24 = vadd.s32 %v835_v60, %v833_v42  ;;  %vm852_vm10 = vc.u32 %v844_v15, %v848_v45  ;;  %v854_v34 = vadd.s32 %v848_v45, %v844_v15 }
  0x84   : > { %v285_v4 = vmul.f32 %v284_v57, %v3343_v14  ;;  %v294_v43 = vxor.u32 2147483648, %v277_v56  ;;  %v851_v9 = vshrl.u32 %v3361_v13, 16  ;;  %v853_v10 = vsel %vm852_vm10, 1, %v2984_v50 }
  0x85   : > { %v420_v11 = vxor.u32 2147483648, %v419_v5  ;;  %v838_v16 = vadd.s32 %v837_v24, %v827_v47  ;;  %v855_v17 = vadd.s32 %v853_v10, %v847_v20  ;;  %vm856_vm11 = vc.u32 %v854_v34, %v850_v54 }
  0x86   : > { %v291_v3 = vxor.u32 2147483648, %v285_v4  ;;  %v295_v21 = vsel %vm293_vm1, %v294_v43, %v285_v4  ;;  %v607_v8 = vsel %vm605_vm8, %v294_v43, %v285_v4  ;;  %v857_v15 = vsel %vm856_vm11, 1, %v2984_v50 }
  0x87   : > { %v421_v14 = vsel %vm300_vm14, %v420_v11, %v419_v5  ;;  %v3388_v22 = vadd.s32 %v838_v16, %v829_v25  ;;  %v3390_v13 = vadd.s32 %v854_v34, %v850_v54  ;;  %v859_v48 = vadd.s32 %v857_v15, %v855_v17 }
  0x88   : > { %v292_v20 = vsel %vm290_vm2, %v277_v56, %v291_v3  ;;  %v424_v32 = vsel %vm3334_vm15, %v3098_v1, %v421_v14  ;;  %v604_v36 = vsel %vm602_vm5, %v277_v56, %v291_v3  ;;  %v927_v39 = vand.u32 2139095040, %v3292_v23 }
  0x89   : > { %v296_v19 = vsel %vm289_vm3, %v292_v20, %v295_v21  ;;  %v426_v40 = vmul.f32 %v424_v32, %v424_v32  ;;  %v608_v55 = vsel %vm601_vm4, %v604_v36, %v607_v8  ;;  %v860_v28 = vadd.s32 %v859_v48, %v849_v61 }
  0x8a   : > { %v297_v45 = vsel %vm286_vm6, nan, %v296_v19  ;;  %v609_v58 = vsel %vm286_vm6, nan, %v608_v55  ;;  %v924_v46 = vand.u32 2147483647, %v3292_v23  ;;  %v928_v12 = vshrl.u32 %v927_v39, 23 }
  0x8b   : > { %v427_v47 = vmul.f32 -0.001358992, %v426_v40  ;;  %v434_v63 = vmul.f32 -0.00019511016, %v426_v40  ;;  %2771 = vst [vmem:[%s3100_s26 + $0x10] sm:$0xff] %v297_v45  ;;  %v861_v25 = vadd.s32 %v860_v28, %v851_v9  ;;  %v442_v62 = vadd.s32 3, %v3352_v7 }
  0x8c   : > { %2779 = vst [vmem:[%s3100_s26 + $0x20] sm:$0xff] %v609_v58  ;;  %v862_v30 = vmul.u32 %v3306_v41, %v3356_v26  ;;  %vm864_vm12 = vc.u32 %v3388_v22, %v3390_v13  ;;  %v2784_v2 = vadd.s32 4294967169, %v928_v12  ;;  %v931_v37 = vand.u32 8388607, %v924_v46 }
  0x8d   : > { %v428_v59 = vadd.f32 0.041655596, %v427_v47  ;;  %v435_v51 = vadd.f32 0.008332121, %v434_v63  ;;  %v865_v49 = vadd.s32 1, %v861_v25  ;;  %v443_v54 = vand.u32 3, %v442_v62 }
  0x8e   : > { %v934_v42 = vadd.s32 1, %v2784_v2  ;;  %v754_v41 = vand.u32 3, %v3352_v7  ;;  %v3420_v5 = vmul.f32 4.0, %v3096_v0  ;;  %v932_v4 = vor.u32 8388608, %v931_v37 }
  0x8f   : > { %v429_v52 = vmul.f32 %v428_v59, %v426_v40  ;;  %v436_v53 = vmul.f32 %v435_v51, %v426_v40  ;;  %v866_v38 = vsel %vm864_vm12, %v865_v49, %v861_v25  ;;  %vm441_vm14 = vweird.f32 %v3098_v1 }
  0x90   : > { %v867_v56 = vadd.s32 %v866_v38, %v862_v30  ;;  %vm935_vm13 = vcmp.gt.s32.totalorder %v934_v42, 0  ;;  %vm444_vm15 = vcmp.lt.s32.totalorder %v443_v54, 2  ;;  %vm445_vm0 = vcmp.eq.s32.totalorder %v443_v54, 0 }
  0x91   : > { %v430_v57 = vadd.f32 -0.4999988, %v429_v52  ;;  %v437_v60 = vadd.f32 -0.16666654, %v436_v53  ;;  %v936_v61 = vsel %vm935_vm13, %v934_v42, 0  ;;  %vm448_vm1 = vcmp.eq.s32.totalorder %v443_v54, 2 }
  0x92   : > { %v868_v26 = vadd.s32 536870912, %v867_v56  ;;  %v938_v43 = vand.u32 31, %v936_v61  ;;  %vm755_vm2 = vcmp.lt.s32.totalorder %v754_v41, 2  ;;  %vm756_vm3 = vcmp.eq.s32.totalorder %v754_v41, 0 }
  0x93   : > { %v431_v24 = vmul.f32 %v430_v57, %v426_v40  ;;  %v438_v34 = vmul.f32 %v437_v60, %v426_v40  ;;  %vm759_vm4 = vcmp.eq.s32.totalorder %v754_v41, 2  ;;  %v3426_v3 = vshll.u32 %v932_v4, 8 }
  0x94   : > { %v3423_v9 = vshrl.u32 %v868_v26, 30  ;;  %v939_v16 = vsub.s32 32, %v938_v43  ;;  %v1398_v21 = vand.u32 2139095040, %v3420_v5  ;;  %v3431_v15 = vshrl.u32 %v936_v61, 5 }
  0x95   : > { %v432_v10 = vadd.f32 1.0, %v431_v24  ;;  %v439_v11 = vadd.f32 1.0, %v438_v34  ;;  %v941_v14 = vshll.u32 %v2978_v27, %v938_v43  ;;  %v944_v48 = vshll.u32 %v2979_v29, %v938_v43 }
  0x96   : > { %v870_v0 = vshll.u32 %v3423_v9, 30  ;;  %v942_v19 = vshrl.u32 %v2979_v29, %v939_v16  ;;  %vm771_vm5 = vcmp.lt.s32.totalorder %v3111_v6, 0  ;;  %v945_v40 = vshrl.u32 %v2980_v31, %v939_v16 }
  0x97   : > { %v440_v7 = vmul.f32 %v439_v11, %v424_v32  ;;  %v449_v17 = vxor.u32 2147483648, %v432_v10  ;;  %v947_v55 = vshll.u32 %v2980_v31, %v938_v43  ;;  %v948_v58 = vshrl.u32 %v2981_v33, %v939_v16 }
  0x98   : > { %v3429_v8 = vsub.s32 %v867_v56, %v870_v0  ;;  %v950_v47 = vshll.u32 %v2981_v33, %v938_v43  ;;  %v951_v62 = vshrl.u32 %v2982_v35, %v939_v16  ;;  %vm3455_vm7 = vcmp.le.f32.partialorder %v769_v18, 0.7853982 }
  0x99   : > { %v446_v20 = vxor.u32 2147483648, %v440_v7  ;;  %v450_v36 = vsel %vm448_vm1, %v449_v17, %v440_v7  ;;  %v761_v39 = vsel %vm759_vm4, %v449_v17, %v440_v7  ;;  %v943_v2 = vor.u32 %v942_v19, %v941_v14 }
  0x9a   : > { %vm872_vm6 = vcmp.lt.s32.totalorder %v3429_v8, 0  ;;  %v873_v32 = vsub.s32 0, %v3429_v8  ;;  %v946_v37 = vor.u32 %v945_v40, %v944_v48  ;;  %v952_v52 = vor.u32 %v951_v62, %v950_v47 }
  0x9b   : > { %v447_v28 = vsel %vm445_vm0, %v432_v10, %v446_v20  ;;  %v758_v45 = vsel %vm756_vm3, %v432_v10, %v446_v20  ;;  %v953_v53 = vshll.u32 %v2982_v35, %v938_v43  ;;  %v954_v38 = vshrl.u32 %v2983_v44, %v939_v16 }
  0x9c   : > { %v451_v63 = vsel %vm444_vm15, %v447_v28, %v450_v36  ;;  %v762_v25 = vsel %vm755_vm2, %v758_v45, %v761_v39  ;;  %v874_v12 = vsel %vm872_vm6, %v873_v32, %v3429_v8  ;;  %v893_v1 = vsub.s32 4, %v3423_v9 }
  0x9d   : > { %v452_v30 = vsel %vm441_vm14, nan, %v451_v63  ;;  %v763_v59 = vsel %vm441_vm14, nan, %v762_v25  ;;  %v875_v49 = vclz %v874_v12  ;;  %vm956_vm8 = vcmp.lt.s32.totalorder %v3431_v15, 1 }
  0x9e   : > { %2772 = vst [vmem:[%s3100_s26 + $0x18] sm:$0xff] %v452_v30  ;;  %vm959_vm9 = vcmp.lt.s32.totalorder %v3431_v15, 4  ;;  %v863_v18 = vadd.s32 %v3390_v13, %v3388_v22  ;;  %v949_v54 = vor.u32 %v948_v58, %v947_v55  ;;  %v1395_v56 = vand.u32 2147483647, %v3420_v5 }
  0x9f   : > { %2780 = vst [vmem:[%s3100_s26 + $0x28] sm:$0xff] %v763_v59  ;;  %v2782_v42 = vadd.s32 4294967294, %v875_v49  ;;  %v1399_v57 = vshrl.u32 %v1398_v21, 23  ;;  %vm957_vm11 = vcmp.lt.s32.totalorder %v3431_v15, 2  ;;  %vm958_vm12 = vcmp.lt.s32.totalorder %v3431_v15, 3 }
  0xa0   : > { %v973_v60 = vand.u32 65535, %v3426_v3  ;;  %v955_v26 = vor.u32 %v954_v38, %v953_v53  ;;  %v964_v61 = vsel %vm956_vm8, %v943_v2, %v946_v37  ;;  %v965_v24 = vsel %vm959_vm9, %v952_v52, 920167782 }
  0xa1   : > { %vm2783_vm10 = vcmp.lt.s32.totalorder %v2782_v42, 0  ;;  %v894_v4 = vsel %vm771_vm5, %v893_v1, %v3423_v9  ;;  %v940_v43 = vshrl.u32 %v2978_v27, %v939_v16  ;;  %v966_v10 = vsel %vm958_vm12, %v949_v54, %v965_v24 }
  0xa2   : > { %v878_v41 = vsel %vm2783_vm10, 0, %v2782_v42  ;;  %v974_v11 = vshrl.u32 %v3426_v3, 16  ;;  %v2797_v0 = vadd.s32 4294967169, %v1399_v57  ;;  %v967_v21 = vsel %vm957_vm11, %v964_v61, %v966_v10 }
  0xa3   : > { %v879_v22 = vsub.s32 32, %v878_v41  ;;  %v880_v13 = vshll.u32 %v3429_v8, %v878_v41  ;;  %v883_v34 = vsub.s32 4294967266, %v878_v41  ;;  %v968_v8 = vsel %vm956_vm8, %v946_v37, %v949_v54 }
  0xa4   : > { %v3490_v14 = vsel %vm3455_vm7, 0, %v894_v4  ;;  %v969_v9 = vsel %vm959_vm9, %v955_v26, 1326507024  ;;  %v997_v16 = vand.u32 65535, %v967_v21  ;;  %v998_v48 = vshrl.u32 %v967_v21, 16 }
  0xa5   : > { %v881_v7 = vshrl.u32 %v863_v18, %v879_v22  ;;  %v884_v17 = vadd.s32 127, %v883_v34  ;;  %v961_v39 = vsel %vm959_vm9, %v949_v54, 2102212464  ;;  %v970_v19 = vsel %vm958_vm12, %v952_v52, %v969_v9 }
  0xa6   : > { %v971_v32 = vsel %vm957_vm11, %v968_v8, %v970_v19  ;;  %v999_v40 = vmul.u32 %v997_v16, %v973_v60  ;;  %v1000_v55 = vmul.u32 %v998_v48, %v973_v60  ;;  %v1001_v28 = vmul.u32 %v997_v16, %v974_v11 }
  0xa7   : > { %v882_v20 = vor.u32 %v881_v7, %v880_v13  ;;  %v885_v36 = vshll.u32 %v884_v17, 23  ;;  %v975_v47 = vand.u32 65535, %v971_v32  ;;  %v976_v63 = vshrl.u32 %v971_v32, 16 }
  0xa8   : > { %v960_v25 = vsel %vm956_vm8, %v940_v43, %v943_v2  ;;  %v1002_v12 = vmul.u32 %v998_v48, %v974_v11  ;;  %v1003_v62 = vshll.u32 %v1000_v55, 16  ;;  %v1005_v30 = vshll.u32 %v1001_v28, 16 }
  0xa9   : > { %v886_v45 = vor.u32 4788187, %v885_v36  ;;  %v889_v58 = vcvt.s32.f32 %v882_v20  ;;  %v977_v49 = vmul.u32 %v975_v47, %v973_v60  ;;  %v978_v53 = vmul.u32 %v976_v63, %v973_v60 }
  0xaa   : > { %v979_v52 = vmul.u32 %v975_v47, %v974_v11  ;;  %v962_v38 = vsel %vm958_vm12, %v946_v37, %v961_v39  ;;  %vm1007_vm13 = vc.u32 %v999_v40, %v1003_v62  ;;  %v1009_v42 = vadd.s32 %v1003_v62, %v999_v40 }
  0xab   : > { %v887_v59 = vand.u32 2147483647, %v886_v45  ;;  %v1405_v1 = vadd.s32 1, %v2797_v0  ;;  %v980_v54 = vmul.u32 %v976_v63, %v974_v11  ;;  %v981_v57 = vshll.u32 %v978_v53, 16 }
  0xac   : > { %v983_v41 = vshll.u32 %v979_v52, 16  ;;  %v1004_v26 = vshrl.u32 %v1000_v55, 16  ;;  %v1006_v61 = vshrl.u32 %v1001_v28, 16  ;;  %v1008_v2 = vsel %vm1007_vm13, 1, %v2984_v50  ;;  %v3522_v55 = vld [vmem:[%s3100_s26 + $0x8] sm:$0xff] }
  0xad   : > { %v890_v18 = vmul.f32 %v889_v58, %v887_v59  ;;  %vm1011_vm14 = vc.u32 %v1009_v42, %v1005_v30  ;;  %vm985_vm15 = vc.u32 %v977_v49, %v981_v57  ;;  %v987_v22 = vadd.s32 %v981_v57, %v977_v49 }
  0xae   : > { %v1010_v60 = vadd.s32 %v1008_v2, %v1002_v12  ;;  %v982_v13 = vshrl.u32 %v978_v53, 16  ;;  %v986_v34 = vsel %vm985_vm15, 1, %v2984_v50  ;;  %v1012_v37 = vsel %vm1011_vm14, 1, %v2984_v50 }
  0xaf   : > { %v891_v24 = vxor.u32 2147483648, %v890_v18  ;;  %vm1406_vm0 = vcmp.gt.s32.totalorder %v1405_v1, 0  ;;  %v988_v43 = vadd.s32 %v986_v34, %v980_v54  ;;  %vm989_vm1 = vc.u32 %v987_v22, %v983_v41 }
  0xb0   : > { %v1014_v10 = vadd.s32 %v1012_v37, %v1010_v60  ;;  %v963_v0 = vsel %vm957_vm11, %v960_v25, %v962_v38  ;;  %v990_v7 = vsel %vm989_vm1, 1, %v2984_v50  ;;  %v1407_v17 = vsel %vm1406_vm0, %v1405_v1, 0 }
  0xb1   : > { %v892_v4 = vsel %vm771_vm5, %v891_v24, %v890_v18  ;;  %v984_v8 = vshrl.u32 %v979_v52, 16  ;;  %v992_v9 = vadd.s32 %v990_v7, %v988_v43  ;;  %v913_v48 = vadd.s32 3, %v3490_v14 }
  0xb2   : > { %v895_v11 = vsel %vm3455_vm7, %v3111_v6, %v892_v4  ;;  %v1015_v16 = vadd.s32 %v1014_v10, %v1004_v26  ;;  %v3516_v20 = vadd.s32 %v1009_v42, %v1005_v30  ;;  %v1402_v36 = vand.u32 8388607, %v1395_v56 }
  0xb3   : > { %v897_v21 = vmul.f32 %v895_v11, %v895_v11  ;;  %v1409_v51 = vand.u32 31, %v1407_v17  ;;  %v993_v15 = vadd.s32 %v992_v9, %v982_v13  ;;  %v1017_v40 = vmul.u32 %v3426_v3, %v963_v0 }
  0xb4   : > { %v1016_v32 = vadd.s32 %v1015_v16, %v1006_v61  ;;  %v3525_v28 = vmul.f32 4.0, %v3522_v55  ;;  %v914_v12 = vand.u32 3, %v913_v48  ;;  %v1403_v62 = vor.u32 8388608, %v1402_v36 }
  0xb5   : > { %v898_v39 = vmul.f32 -0.001358992, %v897_v21  ;;  %v905_v19 = vmul.f32 -0.00019511016, %v897_v21  ;;  %v3527_v45 = vsub.s32 32, %v1409_v51  ;;  %v3529_v63 = vadd.s32 %v993_v15, %v984_v8 }
  0xb6   : > { %v1020_v25 = vadd.s32 1, %v1016_v32  ;;  %v3531_v30 = vshrl.u32 %v1407_v17, 5  ;;  %v1412_v59 = vshll.u32 %v2978_v27, %v1409_v51  ;;  %v1415_v53 = vshll.u32 %v2979_v29, %v1409_v51 }
  0xb7   : > { %v899_v58 = vadd.f32 0.041655596, %v898_v39  ;;  %v906_v47 = vadd.f32 0.008332121, %v905_v19  ;;  %vm1019_vm2 = vc.u32 %v3529_v63, %v3516_v20  ;;  %v1416_v38 = vshrl.u32 %v2980_v31, %v3527_v45 }
  0xb8   : > { %v1021_v52 = vsel %vm1019_vm2, %v1020_v25, %v1016_v32  ;;  %v1418_v42 = vshll.u32 %v2980_v31, %v1409_v51  ;;  %v1419_v1 = vshrl.u32 %v2981_v33, %v3527_v45  ;;  %v1421_v41 = vshll.u32 %v2981_v33, %v1409_v51 }
  0xb9   : > { %v900_v49 = vmul.f32 %v899_v58, %v897_v21  ;;  %v907_v3 = vmul.f32 %v906_v47, %v897_v21  ;;  %v1022_v57 = vadd.s32 %v1021_v52, %v1017_v40  ;;  %v1413_v26 = vshrl.u32 %v2979_v29, %v3527_v45 }
  0xba   : > { %v1422_v61 = vshrl.u32 %v2982_v35, %v3527_v45  ;;  %v1424_v2 = vshll.u32 %v2982_v35, %v1409_v51  ;;  %v1425_v24 = vshrl.u32 %v2983_v44, %v3527_v45  ;;  %vm915_vm3 = vcmp.lt.s32.totalorder %v914_v12, 2 }
  0xbb   : > { %v901_v18 = vadd.f32 -0.4999988, %v900_v49  ;;  %v908_v54 = vadd.f32 -0.16666654, %v907_v3  ;;  %v1023_v13 = vadd.s32 536870912, %v1022_v57  ;;  %vm919_vm4 = vcmp.eq.s32.totalorder %v914_v12, 2 }
  0xbc   : > { %v3550_v34 = vor.u32 %v1416_v38, %v1415_v53  ;;  %v1423_v37 = vor.u32 %v1422_v61, %v1421_v41  ;;  %v1426_v4 = vor.u32 %v1425_v24, %v1424_v2  ;;  %v1420_v7 = vor.u32 %v1419_v1, %v1418_v42 }
  0xbd   : > { %v902_v22 = vmul.f32 %v901_v18, %v897_v21  ;;  %v909_v60 = vmul.f32 %v908_v54, %v897_v21  ;;  %v3554_v0 = vshrl.u32 %v1023_v13, 30  ;;  %v1414_v17 = vor.u32 %v1413_v26, %v1412_v59 }
  0xbe   : > { %vm1427_vm5 = vcmp.lt.s32.totalorder %v3531_v30, 1  ;;  %vm1430_vm6 = vcmp.lt.s32.totalorder %v3531_v30, 4  ;;  %v3558_v8 = vshll.u32 %v1403_v62, 8  ;;  %vm1429_vm7 = vcmp.lt.s32.totalorder %v3531_v30, 3 }
  0xbf   : > { %v3552_v43 = vadd.f32 1.0, %v902_v22  ;;  %v910_v10 = vadd.f32 1.0, %v909_v60  ;;  %v1025_v16 = vshll.u32 %v3554_v0, 30  ;;  %vm916_vm8 = vcmp.eq.s32.totalorder %v914_v12, 0 }
  0xc0   : > { %vm1428_vm9 = vcmp.lt.s32.totalorder %v3531_v30, 2  ;;  %v1436_v48 = vsel %vm1430_vm6, %v1423_v37, 920167782  ;;  %v1440_v36 = vsel %vm1430_vm6, %v1426_v4, 1326507024  ;;  %v1439_v19 = vsel %vm1427_vm5, %v3550_v34, %v1420_v7 }
  0xc1   : > { %v3560_v21 = vmul.f32 %v910_v10, %v895_v11  ;;  %v920_v9 = vxor.u32 2147483648, %v3552_v43  ;;  %v1026_v39 = vsub.s32 %v1022_v57, %v1025_v16  ;;  %vm912_vm10 = vweird.f32 %v3111_v6 }
  0xc2   : > { %v1435_v15 = vsel %vm1427_vm5, %v1414_v17, %v3550_v34  ;;  %v1441_v32 = vsel %vm1429_vm7, %v1423_v37, %v1440_v36  ;;  %v1444_v40 = vand.u32 65535, %v3558_v8  ;;  %v1437_v25 = vsel %vm1429_vm7, %v1420_v7, %v1436_v48 }
  0xc3   : > { %v917_v51 = vxor.u32 2147483648, %v3560_v21  ;;  %v921_v11 = vsel %vm919_vm4, %v920_v9, %v3560_v21  ;;  %vm1027_vm11 = vcmp.lt.s32.totalorder %v1026_v39, 0  ;;  %v1028_v47 = vsub.s32 0, %v1026_v39 }
  0xc4   : > { %v1442_v59 = vsel %vm1428_vm9, %v1439_v19, %v1441_v32  ;;  %v1411_v42 = vshrl.u32 %v2978_v27, %v3527_v45  ;;  %v1438_v1 = vsel %vm1428_vm9, %v1435_v15, %v1437_v25  ;;  %v1445_v12 = vshrl.u32 %v3558_v8, 16 }
  0xc5   : > { %v918_v58 = vsel %vm916_vm8, %v3552_v43, %v917_v51  ;;  %v1029_v3 = vsel %vm1027_vm11, %v1028_v47, %v1026_v39  ;;  %v1446_v53 = vand.u32 65535, %v1442_v59  ;;  %v1447_v52 = vshrl.u32 %v1442_v59, 16 }
  0xc6   : > { %v922_v62 = vsel %vm915_vm3, %v918_v58, %v921_v11  ;;  %v1030_v38 = vclz %v1029_v3  ;;  %v1553_v54 = vand.u32 2139095040, %v3525_v28  ;;  %v1018_v57 = vadd.s32 %v3516_v20, %v3529_v63 }
  0xc7   : > { %v923_v49 = vsel %vm912_vm10, nan, %v922_v62  ;;  %v3599_v18 = vmul.u32 %v1447_v52, %v1444_v40  ;;  %v1550_v26 = vand.u32 2147483647, %v3525_v28  ;;  %vm926_vm12 = vcmp.lt.s32.totalorder %v3292_v23, 0 }
  0xc8   : > { %2787 = vst [vmem:[%s3100_s26 + $0x30] sm:$0xff] %v923_v49  ;;  %v2785_v41 = vadd.s32 4294967294, %v1030_v38  ;;  %v1448_v61 = vmul.u32 %v1446_v53, %v1444_v40  ;;  %v1468_v2 = vand.u32 65535, %v1438_v1  ;;  %v1469_v24 = vshrl.u32 %v1438_v1, 16 }
  0xc9   : > { %v1452_v45 = vshll.u32 %v3599_v18, 16  ;;  %v1048_v22 = vsub.s32 4, %v3554_v0  ;;  %v3610_v60 = vsel %vm1427_vm5, %v1411_v42, %v1414_v17  ;;  %v1432_v20 = vsel %vm1430_vm6, %v1420_v7, 2102212464 }
  0xca   : > { %vm2786_vm13 = vcmp.lt.s32.totalorder %v2785_v41, 0  ;;  %v1226_v13 = vand.u32 3, %v3490_v14  ;;  %v1450_v37 = vmul.u32 %v1446_v53, %v1445_v12  ;;  %v1554_v4 = vshrl.u32 %v1553_v54, 23 }
  0xcb   : > { %v1033_v63 = vsel %vm2786_vm13, 0, %v2785_v41  ;;  %v1451_v36 = vmul.u32 %v1447_v52, %v1445_v12  ;;  %vm3617_vm14 = vcmp.le.f32.partialorder %v924_v46, 0.7853982  ;;  %vm1456_vm0 = vc.u32 %v1448_v61, %v1452_v45 }
  0xcc   : > { %v1034_v10 = vsub.s32 32, %v1033_v63  ;;  %v1035_v16 = vshll.u32 %v1026_v39, %v1033_v63  ;;  %v1038_v48 = vsub.s32 4294967266, %v1033_v63  ;;  %vm1228_vm15 = vcmp.eq.s32.totalorder %v1226_v13, 0 }
  0xcd   : > { %v1470_v17 = vmul.u32 %v1468_v2, %v1444_v40  ;;  %v1471_v19 = vmul.u32 %v1469_v24, %v1444_v40  ;;  %vm1227_vm1 = vcmp.lt.s32.totalorder %v1226_v13, 2  ;;  %v1230_v14 = vsel %vm1228_vm15, %v3552_v43, %v917_v51 }
  0xce   : > { %v1036_v7 = vshrl.u32 %v1018_v57, %v1034_v10  ;;  %v1039_v15 = vadd.s32 127, %v1038_v48  ;;  %vm1231_vm2 = vcmp.eq.s32.totalorder %v1226_v13, 2  ;;  %v1454_v39 = vshll.u32 %v1450_v37, 16 }
  0xcf   : > { %v1472_v32 = vmul.u32 %v1468_v2, %v1445_v12  ;;  %v1473_v58 = vmul.u32 %v1469_v24, %v1445_v12  ;;  %v1233_v46 = vsel %vm1231_vm2, %v920_v9, %v3560_v21  ;;  %v1457_v62 = vsel %vm1456_vm0, 1, %v2984_v50 }
  0xd0   : > { %v1037_v47 = vor.u32 %v1036_v7, %v1035_v16  ;;  %v1040_v25 = vshll.u32 %v1039_v15, 23  ;;  %v1234_v59 = vsel %vm1227_vm1, %v1230_v14, %v1233_v46  ;;  %v1458_v40 = vadd.s32 %v1452_v45, %v1448_v61 }
  0xd1   : > { %v1459_v49 = vadd.s32 %v1457_v62, %v1451_v36  ;;  %v1474_v3 = vshll.u32 %v1471_v19, 16  ;;  %v1049_v51 = vsel %vm926_vm12, %v1048_v22, %v3554_v0  ;;  %v1235_v38 = vsel %vm912_vm10, nan, %v1234_v59 }
  0xd2   : > { %v1041_v53 = vor.u32 4788187, %v1040_v25  ;;  %v1044_v52 = vcvt.s32.f32 %v1037_v47  ;;  %2795 = vst [vmem:[%s3100_s26 + $0x40] sm:$0xff] %v1235_v38  ;;  %v1453_v42 = vshrl.u32 %v3599_v18, 16  ;;  %vm1460_vm3 = vc.u32 %v1458_v40, %v1454_v39 }
  0xd3   : > { %v1476_v43 = vshll.u32 %v1472_v32, 16  ;;  %vm1478_vm4 = vc.u32 %v1470_v17, %v1474_v3  ;;  %v1461_v9 = vsel %vm1460_vm3, 1, %v2984_v50  ;;  %v1480_v12 = vadd.s32 %v1474_v3, %v1470_v17 }
  0xd4   : > { %v1042_v21 = vand.u32 2147483647, %v1041_v53  ;;  %v1479_v1 = vsel %vm1478_vm4, 1, %v2984_v50  ;;  %v1455_v54 = vshrl.u32 %v1450_v37, 16  ;;  %v1463_v57 = vadd.s32 %v1461_v9, %v1459_v49 }
  0xd5   : > { %v1481_v41 = vadd.s32 %v1479_v1, %v1473_v58  ;;  %v2800_v61 = vadd.s32 4294967169, %v1554_v4  ;;  %v1051_v6 = vsel %vm3617_vm14, 0, %v1049_v51  ;;  %v1475_v45 = vshrl.u32 %v1471_v19, 16 }
  0xd6   : > { %v1045_v0 = vmul.f32 %v1044_v52, %v1042_v21  ;;  %vm1482_vm5 = vc.u32 %v1480_v12, %v1476_v43  ;;  %v1433_v18 = vsel %vm1429_vm7, %v3550_v34, %v1432_v20  ;;  %v1464_v2 = vadd.s32 %v1463_v57, %v1453_v42 }
  0xd7   : > { %v1483_v24 = vsel %vm1482_vm5, 1, %v2984_v50  ;;  %v1560_v22 = vadd.s32 1, %v2800_v61  ;;  %v1477_v13 = vshrl.u32 %v1472_v32, 16  ;;  %v1068_v10 = vadd.s32 3, %v1051_v6 }
  0xd8   : > { %v1046_v63 = vxor.u32 2147483648, %v1045_v0  ;;  %v1485_v37 = vadd.s32 %v1483_v24, %v1481_v41  ;;  %v3641_v16 = vadd.s32 %v1464_v2, %v1455_v54  ;;  %v3643_v4 = vadd.s32 %v1480_v12, %v1476_v43 }
  0xd9   : > { %vm1561_vm6 = vcmp.gt.s32.totalorder %v1560_v22, 0  ;;  %v1434_v34 = vsel %vm1428_vm9, %v3610_v60, %v1433_v18  ;;  %v1557_v19 = vand.u32 8388607, %v1550_v26  ;;  %v3655_v39 = vand.u32 3, %v1068_v10 }
  0xda   : > { %v1047_v48 = vsel %vm926_vm12, %v1046_v63, %v1045_v0  ;;  %v1486_v20 = vadd.s32 %v1485_v37, %v1475_v45  ;;  %v1562_v36 = vsel %vm1561_vm6, %v1560_v22, 0  ;;  %v1488_v32 = vmul.u32 %v3558_v8, %v1434_v34 }
  0xdb   : > { %v1050_v17 = vsel %vm3617_vm14, %v3292_v23, %v1047_v48  ;;  %v1564_v14 = vand.u32 31, %v1562_v36  ;;  %vm1490_vm7 = vc.u32 %v3641_v16, %v3643_v4  ;;  %v3660_v30 = vshrl.u32 %v1562_v36, 5 }
  0xdc   : > { %v1052_v7 = vmul.f32 %v1050_v17, %v1050_v17  ;;  %v1487_v15 = vadd.s32 %v1486_v20, %v1477_v13  ;;  %v3664_v25 = vand.u32 3, %v1051_v6  ;;  %v1558_v46 = vor.u32 8388608, %v1557_v19 }
  0xdd   : > { %v3662_v11 = vsub.s32 32, %v1564_v14  ;;  %v1567_v62 = vshll.u32 %v2978_v27, %v1564_v14  ;;  %v1570_v59 = vshll.u32 %v2979_v29, %v1564_v14  ;;  %v1573_v3 = vshll.u32 %v2980_v31, %v1564_v14 }
  0xde   : > { %v1053_v60 = vmul.f32 -0.001358992, %v1052_v7  ;;  %v1060_v58 = vmul.f32 -0.00019511016, %v1052_v7  ;;  %v1491_v47 = vadd.s32 1, %v1487_v15  ;;  %vm1074_vm8 = vcmp.eq.s32.totalorder %v3655_v39, 2 }
  0xdf   : > { %v1568_v52 = vshrl.u32 %v2979_v29, %v3662_v11  ;;  %v1571_v51 = vshrl.u32 %v2980_v31, %v3662_v11  ;;  %v1576_v38 = vshll.u32 %v2981_v33, %v1564_v14  ;;  %v1574_v21 = vshrl.u32 %v2981_v33, %v3662_v11 }
  0xe0   : > { %v1054_v40 = vadd.f32 0.041655596, %v1053_v60  ;;  %v1061_v49 = vadd.f32 0.008332121, %v1060_v58  ;;  %v1492_v8 = vsel %vm1490_vm7, %v1491_v47, %v1487_v15  ;;  %vm1582_vm9 = vcmp.lt.s32.totalorder %v3660_v30, 1 }
  0xe1   : > { %v1493_v53 = vadd.s32 %v1492_v8, %v1488_v32  ;;  %vm1071_vm10 = vcmp.eq.s32.totalorder %v3655_v39, 0  ;;  %v3679_v1 = vor.u32 %v1568_v52, %v1567_v62  ;;  %v1577_v12 = vshrl.u32 %v2982_v35, %v3662_v11 }
  0xe2   : > { %v1055_v42 = vmul.f32 %v1054_v40, %v1052_v7  ;;  %v1062_v43 = vmul.f32 %v1061_v49, %v1052_v7  ;;  %vm1585_vm11 = vcmp.lt.s32.totalorder %v3660_v30, 4  ;;  %vm1070_vm12 = vcmp.lt.s32.totalorder %v3655_v39, 2 }
  0xe3   : > { %v1494_v9 = vadd.s32 536870912, %v1493_v53  ;;  %v3685_v41 = vor.u32 %v1571_v51, %v1570_v59  ;;  %v1579_v61 = vshll.u32 %v2982_v35, %v1564_v14  ;;  %vm1067_vm13 = vweird.f32 %v3292_v23  ;;  %v2905_v14 = vld [vmem:[%s3100_s26] sm:$0xff] }
  0xe4   : > { %v1056_v54 = vadd.f32 -0.4999988, %v1055_v42  ;;  %v1063_v57 = vadd.f32 -0.16666654, %v1062_v43  ;;  %v3691_v6 = vor.u32 %v1574_v21, %v1573_v3  ;;  %v1578_v45 = vor.u32 %v1577_v12, %v1576_v38 }
  0xe5   : > { %v3689_v0 = vshrl.u32 %v1494_v9, 30  ;;  %v1580_v18 = vshrl.u32 %v2983_v44, %v3662_v11  ;;  %vm1381_vm14 = vcmp.lt.s32.totalorder %v3664_v25, 2  ;;  %vm1584_vm15 = vcmp.lt.s32.totalorder %v3660_v30, 3 }
  0xe6   : > { %v1057_v2 = vmul.f32 %v1056_v54, %v1052_v7  ;;  %v1064_v24 = vmul.f32 %v1063_v57, %v1052_v7  ;;  %vm1382_vm0 = vcmp.eq.s32.totalorder %v3664_v25, 0  ;;  %vm1583_vm1 = vcmp.lt.s32.totalorder %v3660_v30, 2 }
  0xe7   : > { %v1496_v22 = vshll.u32 %v3689_v0, 30  ;;  %v1581_v63 = vor.u32 %v1580_v18, %v1579_v61  ;;  %v1590_v10 = vsel %vm1582_vm9, %v3679_v1, %v3685_v41  ;;  %v1591_v48 = vsel %vm1585_vm11, %v1578_v45, 920167782 }
  0xe8   : > { %v1058_v13 = vadd.f32 1.0, %v1057_v2  ;;  %v1065_v37 = vadd.f32 1.0, %v1064_v24  ;;  %vm1385_vm2 = vcmp.eq.s32.totalorder %v3664_v25, 2  ;;  %v1592_v20 = vsel %vm1584_vm15, %v3691_v6, %v1591_v48 }
  0xe9   : > { %v1497_v34 = vsub.s32 %v1493_v53, %v1496_v22  ;;  %v3710_v36 = vshll.u32 %v1558_v46, 8  ;;  %v1594_v15 = vsel %vm1582_vm9, %v3685_v41, %v3691_v6  ;;  %v3717_v32 = vmul.f32 8.0, %v2905_v14 }
  0xea   : > { %v1066_v19 = vmul.f32 %v1065_v37, %v1050_v17  ;;  %v1075_v7 = vxor.u32 2147483648, %v1058_v13  ;;  %v1593_v58 = vsel %vm1583_vm1, %v1590_v10, %v1592_v20  ;;  %v1595_v47 = vsel %vm1585_vm11, %v1581_v63, 1326507024 }
  0xeb   : > { %vm1498_vm3 = vcmp.lt.s32.totalorder %v1497_v34, 0  ;;  %v1499_v60 = vsub.s32 0, %v1497_v34  ;;  %v1596_v59 = vsel %vm1584_vm15, %v1578_v45, %v1595_v47  ;;  %v1599_v8 = vand.u32 65535, %v3710_v36 }
  0xec   : > { %v1072_v46 = vxor.u32 2147483648, %v1066_v19  ;;  %v1076_v17 = vsel %vm1074_vm8, %v1075_v7, %v1066_v19  ;;  %v1387_v62 = vsel %vm1385_vm2, %v1075_v7, %v1066_v19  ;;  %v1597_v49 = vsel %vm1583_vm1, %v1594_v15, %v1596_v59 }
  0xed   : > { %v1500_v40 = vsel %vm1498_vm3, %v1499_v60, %v1497_v34  ;;  %v1600_v3 = vshrl.u32 %v3710_v36, 16  ;;  %v1601_v38 = vand.u32 65535, %v1597_v49  ;;  %v1602_v21 = vshrl.u32 %v1597_v49, 16 }
  0xee   : > { %v1073_v53 = vsel %vm1071_vm10, %v1058_v13, %v1072_v46  ;;  %v1384_v52 = vsel %vm1382_vm0, %v1058_v13, %v1072_v46  ;;  %v1501_v51 = vclz %v1500_v40  ;;  %v1624_v9 = vshrl.u32 %v1593_v58, 16 }
  0xef   : > { %v1077_v42 = vsel %vm1070_vm12, %v1073_v53, %v1076_v17  ;;  %v1388_v43 = vsel %vm1381_vm14, %v1384_v52, %v1387_v62  ;;  %v1604_v61 = vmul.u32 %v1602_v21, %v1599_v8  ;;  %v1605_v45 = vmul.u32 %v1601_v38, %v1600_v3 }
  0xf0   : > { %v1078_v12 = vsel %vm1067_vm13, nan, %v1077_v42  ;;  %v1389_v54 = vsel %vm1067_vm13, nan, %v1388_v43  ;;  %v2798_v57 = vadd.s32 4294967294, %v1501_v51  ;;  %v1623_v18 = vand.u32 65535, %v1593_v58 }
  0xf1   : > { %2788 = vst [vmem:[%s3100_s26 + $0x38] sm:$0xff] %v1078_v12  ;;  %vm1397_vm4 = vcmp.lt.s32.totalorder %v3420_v5, 0  ;;  %v1489_v39 = vadd.s32 %v3643_v4, %v3641_v16  ;;  %v1603_v25 = vmul.u32 %v1601_v38, %v1599_v8  ;;  %v2024_v2 = vand.u32 2139095040, %v3717_v32 }
  0xf2   : > { %2796 = vst [vmem:[%s3100_s26 + $0x48] sm:$0xff] %v1389_v54  ;;  %vm2799_vm5 = vcmp.lt.s32.totalorder %v2798_v57, 0  ;;  %v1606_v22 = vmul.u32 %v1602_v21, %v1600_v3  ;;  %v1607_v63 = vshll.u32 %v1604_v61, 16  ;;  %v1626_v23 = vmul.u32 %v1624_v9, %v1599_v8 }
  0xf3   : > { %v1504_v24 = vsel %vm2799_vm5, 0, %v2798_v57  ;;  %v1609_v48 = vshll.u32 %v1605_v45, 16  ;;  %v1519_v20 = vsub.s32 4, %v3689_v0  ;;  %v1566_v19 = vshrl.u32 %v2978_v27, %v3662_v11 }
  0xf4   : > { %v1505_v13 = vsub.s32 32, %v1504_v24  ;;  %v1506_v37 = vshll.u32 %v1497_v34, %v1504_v24  ;;  %v1509_v10 = vsub.s32 4294967266, %v1504_v24  ;;  %v1625_v7 = vmul.u32 %v1623_v18, %v1599_v8 }
  0xf5   : > { %v1627_v15 = vmul.u32 %v1623_v18, %v1600_v3  ;;  %vm1611_vm6 = vc.u32 %v1603_v25, %v1607_v63  ;;  %v1613_v14 = vadd.s32 %v1607_v63, %v1603_v25  ;;  %v1608_v60 = vshrl.u32 %v1604_v61, 16 }
  0xf6   : > { %v1507_v16 = vshrl.u32 %v1489_v39, %v1505_v13  ;;  %v1510_v4 = vadd.s32 127, %v1509_v10  ;;  %v1612_v58 = vsel %vm1611_vm6, 1, %v2984_v50  ;;  %v1628_v47 = vmul.u32 %v1624_v9, %v1600_v3 }
  0xf7   : > { %v1629_v46 = vshll.u32 %v1626_v23, 16  ;;  %v1614_v62 = vadd.s32 %v1612_v58, %v1606_v22  ;;  %vm1615_vm7 = vc.u32 %v1613_v14, %v1609_v48  ;;  %v1587_v59 = vsel %vm1585_vm11, %v3691_v6, 2102212464 }
  0xf8   : > { %v1508_v17 = vor.u32 %v1507_v16, %v1506_v37  ;;  %v1511_v34 = vshll.u32 %v1510_v4, 23  ;;  %v1616_v11 = vsel %vm1615_vm7, 1, %v2984_v50  ;;  %v1631_v40 = vshll.u32 %v1627_v15, 16 }
  0xf9   : > { %vm1633_vm8 = vc.u32 %v1625_v7, %v1629_v46  ;;  %v1618_v53 = vadd.s32 %v1616_v11, %v1614_v62  ;;  %v1520_v3 = vsel %vm1397_vm4, %v1519_v20, %v3689_v0  ;;  %v1635_v51 = vadd.s32 %v1629_v46, %v1625_v7 }
  0xfa   : > { %v1512_v49 = vor.u32 4788187, %v1511_v34  ;;  %v1515_v8 = vcvt.s32.f32 %v1508_v17  ;;  %v1634_v52 = vsel %vm1633_vm8, 1, %v2984_v50  ;;  %v2025_v42 = vshrl.u32 %v2024_v2, 23 }
  0xfb   : > { %v1636_v38 = vadd.s32 %v1634_v52, %v1628_v47  ;;  %vm3763_vm10 = vcmp.le.f32.partialorder %v1395_v56, 0.7853982  ;;  %v1610_v21 = vshrl.u32 %v1605_v45, 16  ;;  %v1619_v9 = vadd.s32 %v1618_v53, %v1608_v60 }
  0xfc   : > { %v1513_v43 = vand.u32 2147483647, %v1512_v49  ;;  %v1586_v12 = vsel %vm1582_vm9, %v1566_v19, %v3679_v1  ;;  %v1630_v54 = vshrl.u32 %v1626_v23, 16  ;;  %vm1637_vm11 = vc.u32 %v1635_v51, %v1631_v40 }
  0xfd   : > { %v2813_v57 = vadd.s32 4294967169, %v2025_v42  ;;  %v3772_v61 = vsel %vm3763_vm10, 0, %v1520_v3  ;;  %v1588_v56 = vsel %vm1584_vm15, %v3685_v41, %v1587_v59  ;;  %v1638_v18 = vsel %vm1637_vm11, 1, %v2984_v50 }
  0xfe   : > { %v1516_v0 = vmul.f32 %v1515_v8, %v1513_v43  ;;  %v1632_v45 = vshrl.u32 %v1627_v15, 16  ;;  %v1640_v39 = vadd.s32 %v1638_v18, %v1636_v38  ;;  %v3778_v24 = vadd.s32 %v1619_v9, %v1610_v21 }
  0xff   : > { %v2031_v25 = vadd.s32 1, %v2813_v57  ;;  %v3780_v1 = vadd.s32 %v1635_v51, %v1631_v40  ;;  %v2021_v22 = vand.u32 2147483647, %v3717_v32  ;;  %v1539_v63 = vadd.s32 3, %v3772_v61 }
 0x100   : > { %v1517_v2 = vxor.u32 2147483648, %v1516_v0  ;;  %v1589_v23 = vsel %vm1583_vm1, %v1586_v12, %v1588_v56  ;;  %v1641_v13 = vadd.s32 %v1640_v39, %v1630_v54  ;;  %v3794_v20 = vmul.f32 8.0, %v3522_v55 }
 0x101   : > { %vm2032_vm9 = vcmp.gt.s32.totalorder %v2031_v25, 0  ;;  %v1643_v7 = vmul.u32 %v3710_v36, %v1589_v23  ;;  %vm1645_vm12 = vc.u32 %v3778_v24, %v3780_v1  ;;  %v3801_v15 = vand.u32 3, %v1539_v63 }
 0x102   : > { %v1518_v41 = vsel %vm1397_vm4, %v1517_v2, %v1516_v0  ;;  %v2033_v37 = vsel %vm2032_vm9, %v2031_v25, 0  ;;  %v1642_v48 = vadd.s32 %v1641_v13, %v1632_v45  ;;  %v2028_v4 = vand.u32 8388607, %v2021_v22 }
 0x103   : > { %v3791_v10 = vsel %vm3763_vm10, %v3420_v5, %v1518_v41  ;;  %v2035_v19 = vand.u32 31, %v2033_v37  ;;  %v2176_v55 = vand.u32 2147483647, %v3794_v20  ;;  %v3806_v46 = vshrl.u32 %v2033_v37, 5 }
 0x104   : > { %v1523_v30 = vmul.f32 %v3791_v10, %v3791_v10  ;;  %v1646_v16 = vadd.s32 1, %v1642_v48  ;;  %v2179_v36 = vand.u32 2139095040, %v3794_v20  ;;  %vm1545_vm13 = vcmp.eq.s32.totalorder %v3801_v15, 2 }
 0x105   : > { %v2036_v14 = vsub.s32 32, %v2035_v19  ;;  %v2041_v17 = vshll.u32 %v2979_v29, %v2035_v19  ;;  %v2044_v11 = vshll.u32 %v2980_v31, %v2035_v19  ;;  %v2047_v8 = vshll.u32 %v2981_v33, %v2035_v19 }
 0x106   : > { %v1524_v60 = vmul.f32 -0.001358992, %v1523_v30  ;;  %v1531_v58 = vmul.f32 -0.00019511016, %v1523_v30  ;;  %v1647_v47 = vsel %vm1645_vm12, %v1646_v16, %v1642_v48  ;;  %v2029_v38 = vor.u32 8388608, %v2028_v4 }
 0x107   : > { %v1648_v59 = vadd.s32 %v1647_v47, %v1643_v7  ;;  %v2042_v40 = vshrl.u32 %v2980_v31, %v2036_v14  ;;  %v2045_v49 = vshrl.u32 %v2981_v33, %v2036_v14  ;;  %v2048_v53 = vshrl.u32 %v2982_v35, %v2036_v14 }
 0x108   : > { %v1525_v34 = vadd.f32 0.041655596, %v1524_v60  ;;  %v1532_v62 = vadd.f32 0.008332121, %v1531_v58  ;;  %vm1542_vm14 = vcmp.eq.s32.totalorder %v3801_v15, 0  ;;  %v2038_v42 = vshll.u32 %v2978_v27, %v2035_v19 }
 0x109   : > { %v1649_v51 = vadd.s32 536870912, %v1648_v59  ;;  %v2039_v6 = vshrl.u32 %v2979_v29, %v2036_v14  ;;  %v2050_v43 = vshll.u32 %v2982_v35, %v2035_v19  ;;  %v2051_v21 = vshrl.u32 %v2983_v44, %v2036_v14 }
 0x10a   : > { %v1526_v52 = vmul.f32 %v1525_v34, %v1523_v30  ;;  %v1533_v3 = vmul.f32 %v1532_v62, %v1523_v30  ;;  %vm1541_vm15 = vcmp.lt.s32.totalorder %v3801_v15, 2  ;;  %v2180_v57 = vshrl.u32 %v2179_v36, 23 }
 0x10b   : > { %v1650_v54 = vshrl.u32 %v1649_v51, 30  ;;  %vm1538_vm0 = vweird.f32 %v3420_v5  ;;  %vm1552_vm1 = vcmp.lt.s32.totalorder %v3525_v28, 0  ;;  %v2043_v0 = vor.u32 %v2042_v40, %v2041_v17 }
 0x10c   : > { %v1527_v9 = vadd.f32 -0.4999988, %v1526_v52  ;;  %v1534_v12 = vadd.f32 -0.16666654, %v1533_v3  ;;  %v2046_v56 = vor.u32 %v2045_v49, %v2044_v11  ;;  %v2049_v18 = vor.u32 %v2048_v53, %v2047_v8 }
 0x10d   : > { %vm2053_vm2 = vcmp.lt.s32.totalorder %v3806_v46, 1  ;;  %v1651_v25 = vshll.u32 %v1650_v54, 30  ;;  %vm2056_vm3 = vcmp.lt.s32.totalorder %v3806_v46, 4  ;;  %v2040_v2 = vor.u32 %v2039_v6, %v2038_v42 }
 0x10e   : > { %v1528_v45 = vmul.f32 %v1527_v9, %v1523_v30  ;;  %v1535_v39 = vmul.f32 %v1534_v12, %v1523_v30  ;;  %v2052_v63 = vor.u32 %v2051_v21, %v2050_v43  ;;  %v3826_v23 = vshll.u32 %v2029_v38, 8 }
 0x10f   : > { %v3830_v13 = vand.u32 8388607, %v2176_v55  ;;  %vm3836_vm4 = vcmp.le.f32.partialorder %v1550_v26, 0.7853982  ;;  %v1652_v19 = vsub.s32 %v1648_v59, %v1651_v25  ;;  %vm2054_vm5 = vcmp.lt.s32.totalorder %v3806_v46, 2 }
 0x110   : > { %v3832_v41 = vadd.f32 1.0, %v1528_v45  ;;  %v1536_v37 = vadd.f32 1.0, %v1535_v39  ;;  %v1674_v30 = vsub.s32 4, %v1650_v54  ;;  %vm2055_vm6 = vcmp.lt.s32.totalorder %v3806_v46, 3 }
 0x111   : > { %v2062_v7 = vsel %vm2056_vm3, %v2049_v18, 920167782  ;;  %v2065_v16 = vsel %vm2053_vm2, %v2043_v0, %v2046_v56  ;;  %vm1653_vm7 = vcmp.lt.s32.totalorder %v1652_v19, 0  ;;  %v1654_v26 = vsub.s32 0, %v1652_v19 }
 0x112   : > { %v1537_v4 = vmul.f32 %v1536_v37, %v3791_v10  ;;  %v1546_v60 = vxor.u32 2147483648, %v3832_v41  ;;  %v2037_v58 = vshrl.u32 %v2978_v27, %v2036_v14  ;;  %v2066_v47 = vsel %vm2056_vm3, %v2052_v63, 1326507024 }
 0x113   : > { %v2070_v17 = vand.u32 65535, %v3826_v23  ;;  %v2816_v36 = vadd.s32 4294967169, %v2180_v57  ;;  %v1655_v59 = vsel %vm1653_vm7, %v1654_v26, %v1652_v19  ;;  %v2067_v10 = vsel %vm2055_vm6, %v2049_v18, %v2066_v47 }
 0x114   : > { %v1543_v34 = vxor.u32 2147483648, %v1537_v4  ;;  %v1547_v62 = vsel %vm1545_vm13, %v1546_v60, %v1537_v4  ;;  %v1656_v11 = vclz %v1655_v59  ;;  %v2061_v40 = vsel %vm2053_vm2, %v2040_v2, %v2043_v0 }
 0x115   : > { %v2063_v14 = vsel %vm2055_vm6, %v2046_v56, %v2062_v7  ;;  %v2068_v49 = vsel %vm2054_vm5, %v2065_v16, %v2067_v10  ;;  %v1644_v53 = vadd.s32 %v3780_v1, %v3778_v24  ;;  %v1675_v52 = vsel %vm1552_vm1, %v1674_v30, %v1650_v54 }
 0x116   : > { %v1544_v8 = vsel %vm1542_vm14, %v3832_v41, %v1543_v34  ;;  %v2073_v3 = vshrl.u32 %v2068_v49, 16  ;;  %v2801_v38 = vadd.s32 4294967294, %v1656_v11  ;;  %v2058_v42 = vsel %vm2056_vm3, %v2046_v56, 2102212464 }
 0x117   : > { %v1548_v51 = vsel %vm1541_vm15, %v1544_v8, %v1547_v62  ;;  %v2071_v6 = vshrl.u32 %v3826_v23, 16  ;;  %v2064_v21 = vsel %vm2054_vm5, %v2061_v40, %v2063_v14  ;;  %v2072_v24 = vand.u32 65535, %v2068_v49 }
 0x118   : > { %v1549_v43 = vsel %vm1538_vm0, nan, %v1548_v51  ;;  %v3878_v1 = vmul.u32 %v2073_v3, %v2070_v17  ;;  %vm2802_vm8 = vcmp.lt.s32.totalorder %v2801_v38, 0  ;;  %v3882_v15 = vsel %vm3836_vm4, 0, %v1675_v52 }
 0x119   : > { %2803 = vst [vmem:[%s3100_s26 + $0x50] sm:$0xff] %v1549_v43  ;;  %v2057_v9 = vsel %vm2053_vm2, %v2037_v58, %v2040_v2  ;;  %v2186_v12 = vadd.s32 1, %v2816_v36  ;;  %v1659_v54 = vsel %vm2802_vm8, 0, %v2801_v38  ;;  %v1852_v57 = vand.u32 3, %v3772_v61 }
 0x11a   : > { %v2059_v56 = vsel %vm2055_vm6, %v2043_v0, %v2058_v42  ;;  %v2094_v18 = vand.u32 65535, %v2064_v21  ;;  %v1660_v45 = vsub.s32 32, %v1659_v54  ;;  %v1661_v39 = vshll.u32 %v1652_v19, %v1659_v54 }
 0x11b   : > { %v1664_v25 = vsub.s32 4294967266, %v1659_v54  ;;  %v2095_v63 = vshrl.u32 %v2064_v21, 16  ;;  %vm1854_vm10 = vcmp.eq.s32.totalorder %v1852_v57, 0  ;;  %v2074_v37 = vmul.u32 %v2072_v24, %v2070_v17 }
 0x11c   : > { %v2076_v30 = vmul.u32 %v2072_v24, %v2071_v6  ;;  %v2078_v7 = vshll.u32 %v3878_v1, 16  ;;  %v1662_v16 = vshrl.u32 %v1644_v53, %v1660_v45  ;;  %vm1853_vm11 = vcmp.lt.s32.totalorder %v1852_v57, 2 }
 0x11d   : > { %v1665_v26 = vadd.s32 127, %v1664_v25  ;;  %v1856_v2 = vsel %vm1854_vm10, %v3832_v41, %v1543_v34  ;;  %vm1857_vm9 = vcmp.eq.s32.totalorder %v1852_v57, 2  ;;  %v3894_v61 = vsel %vm2054_vm5, %v2057_v9, %v2059_v56 }
 0x11e   : > { %v2077_v0 = vmul.u32 %v2073_v3, %v2071_v6  ;;  %vm2187_vm12 = vcmp.gt.s32.totalorder %v2186_v12, 0  ;;  %v1663_v19 = vor.u32 %v1662_v16, %v1661_v39  ;;  %v1859_v47 = vsel %vm1857_vm9, %v1546_v60, %v1537_v4 }
 0x11f   : > { %v1666_v58 = vshll.u32 %v1665_v26, 23  ;;  %v2097_v36 = vmul.u32 %v2095_v63, %v2070_v17  ;;  %v1860_v62 = vsel %vm1853_vm11, %v1856_v2, %v1859_v47  ;;  %v2080_v59 = vshll.u32 %v2076_v30, 16 }
 0x120   : > { %vm2082_vm13 = vc.u32 %v2074_v37, %v2078_v7  ;;  %v2096_v10 = vmul.u32 %v2094_v18, %v2070_v17  ;;  %v1670_v40 = vcvt.s32.f32 %v1663_v19  ;;  %v1861_v41 = vsel %vm1538_vm0, nan, %v1860_v62 }
 0x121   : > { %v1667_v11 = vor.u32 4788187, %v1666_v58  ;;  %v2083_v46 = vsel %vm2082_vm13, 1, %v2984_v50  ;;  %2811 = vst [vmem:[%s3100_s26 + $0x60] sm:$0xff] %v1861_v41  ;;  %v2084_v34 = vadd.s32 %v2078_v7, %v2074_v37  ;;  %v2098_v49 = vmul.u32 %v2094_v18, %v2071_v6 }
 0x122   : > { %v2085_v14 = vadd.s32 %v2083_v46, %v2077_v0  ;;  %v2114_v8 = vmul.u32 %v3826_v23, %v3894_v61  ;;  %v2099_v60 = vmul.u32 %v2095_v63, %v2071_v6  ;;  %v2100_v53 = vshll.u32 %v2097_v36, 16 }
 0x123   : > { %v1668_v4 = vand.u32 2147483647, %v1667_v11  ;;  %v2188_v52 = vsel %vm2187_vm12, %v2186_v12, 0  ;;  %v1694_v17 = vadd.s32 3, %v3882_v15  ;;  %v2079_v3 = vshrl.u32 %v3878_v1, 16 }
 0x124   : > { %vm2086_vm14 = vc.u32 %v2084_v34, %v2080_v59  ;;  %v2102_v5 = vshll.u32 %v2098_v49, 16  ;;  %vm2104_vm15 = vc.u32 %v2096_v10, %v2100_v53  ;;  %v2106_v42 = vadd.s32 %v2100_v53, %v2096_v10 }
 0x125   : > { %v1671_v51 = vmul.f32 %v1670_v40, %v1668_v4  ;;  %v2087_v38 = vsel %vm2086_vm14, 1, %v2984_v50  ;;  %v2081_v43 = vshrl.u32 %v2076_v30, 16  ;;  %v2105_v23 = vsel %vm2104_vm15, 1, %v2984_v50 }
 0x126   : > { %v2089_v21 = vadd.s32 %v2087_v38, %v2085_v14  ;;  %v2190_v24 = vand.u32 31, %v2188_v52  ;;  %v2101_v9 = vshrl.u32 %v2097_v36, 16  ;;  %v2107_v54 = vadd.s32 %v2105_v23, %v2099_v60 }
 0x127   : > { %v1672_v6 = vxor.u32 2147483648, %v1671_v51  ;;  %vm2108_vm0 = vc.u32 %v2106_v42, %v2102_v5  ;;  %v3907_v12 = vand.u32 3, %v1694_v17  ;;  %v2103_v45 = vshrl.u32 %v2098_v49, 16 }
 0x128   : > { %v2090_v57 = vadd.s32 %v2089_v21, %v2079_v3  ;;  %v2109_v1 = vsel %vm2108_vm0, 1, %v2984_v50  ;;  %v3910_v56 = vsub.s32 32, %v2190_v24  ;;  %v3914_v25 = vshrl.u32 %v2188_v52, 5 }
 0x129   : > { %v1673_v18 = vsel %vm1552_vm1, %v1672_v6, %v1671_v51  ;;  %v2111_v39 = vadd.s32 %v2109_v1, %v2107_v54  ;;  %v3921_v30 = vadd.s32 %v2106_v42, %v2102_v5  ;;  %v2193_v7 = vshll.u32 %v2978_v27, %v2190_v24 }
 0x12a   : > { %v1676_v63 = vsel %vm3836_vm4, %v3525_v28, %v1673_v18  ;;  %v3919_v37 = vadd.s32 %v2090_v57, %v2081_v43  ;;  %v2194_v2 = vshrl.u32 %v2979_v29, %v3910_v56  ;;  %v2196_v61 = vshll.u32 %v2979_v29, %v2190_v24 }
 0x12b   : > { %v1678_v16 = vmul.f32 %v1676_v63, %v1676_v63  ;;  %v2112_v26 = vadd.s32 %v2111_v39, %v2101_v9  ;;  %v2197_v0 = vshrl.u32 %v2980_v31, %v3910_v56  ;;  %v2199_v19 = vshll.u32 %v2980_v31, %v2190_v24 }
 0x12c   : > { %v2200_v48 = vshrl.u32 %v2981_v33, %v3910_v56  ;;  %v2202_v58 = vshll.u32 %v2981_v33, %v2190_v24  ;;  %vm2208_vm1 = vcmp.lt.s32.totalorder %v3914_v25, 1  ;;  %vm2116_vm2 = vc.u32 %v3919_v37, %v3921_v30 }
 0x12d   : > { %v1679_v47 = vmul.f32 -0.001358992, %v1678_v16  ;;  %v1686_v36 = vmul.f32 -0.00019511016, %v1678_v16  ;;  %v2113_v62 = vadd.s32 %v2112_v26, %v2103_v45  ;;  %v2203_v29 = vshrl.u32 %v2982_v35, %v3910_v56 }
 0x12e   : > { %v2205_v59 = vshll.u32 %v2982_v35, %v2190_v24  ;;  %v2206_v31 = vshrl.u32 %v2983_v44, %v3910_v56  ;;  %v3941_v33 = vor.u32 %v2194_v2, %v2193_v7  ;;  %v3943_v41 = vor.u32 %v2197_v0, %v2196_v61 }
 0x12f   : > { %v1680_v10 = vadd.f32 0.041655596, %v1679_v47  ;;  %v1687_v11 = vadd.f32 0.008332121, %v1686_v36  ;;  %v2117_v40 = vadd.s32 1, %v2113_v62  ;;  %v3945_v46 = vor.u32 %v2200_v48, %v2199_v19 }
 0x130   : > { %v2204_v34 = vor.u32 %v2203_v29, %v2202_v58  ;;  %v2207_v14 = vor.u32 %v2206_v31, %v2205_v59  ;;  %vm2211_vm3 = vcmp.lt.s32.totalorder %v3914_v25, 4  ;;  %v2006_v35 = vand.u32 3, %v3882_v15 }
 0x131   : > { %v1681_v49 = vmul.f32 %v1680_v10, %v1678_v16  ;;  %v1688_v4 = vmul.f32 %v1687_v11, %v1678_v16  ;;  %v2118_v60 = vsel %vm2116_vm2, %v2117_v40, %v2113_v62  ;;  %v2184_v44 = vor.u32 8388608, %v3830_v13 }
 0x132   : > { %v2119_v53 = vadd.s32 %v2118_v60, %v2114_v8  ;;  %vm2210_vm4 = vcmp.lt.s32.totalorder %v3914_v25, 3  ;;  %vm1696_vm5 = vcmp.lt.s32.totalorder %v3907_v12, 2  ;;  %vm1697_vm6 = vcmp.eq.s32.totalorder %v3907_v12, 0 }
 0x133   : > { %v1682_v52 = vadd.f32 -0.4999988, %v1681_v49  ;;  %v1689_v17 = vadd.f32 -0.16666654, %v1688_v4  ;;  %vm2209_vm7 = vcmp.lt.s32.totalorder %v3914_v25, 2  ;;  %vm1693_vm8 = vweird.f32 %v3525_v28 }
 0x134   : > { %v2120_v3 = vadd.s32 536870912, %v2119_v53  ;;  %v2216_v15 = vsel %vm2208_vm1, %v3941_v33, %v3943_v41  ;;  %v2217_v13 = vsel %vm2211_vm3, %v2204_v34, 920167782  ;;  %v2220_v8 = vsel %vm2208_vm1, %v3943_v41, %v3945_v46 }
 0x135   : > { %v1683_v5 = vmul.f32 %v1682_v52, %v1678_v16  ;;  %v1690_v51 = vmul.f32 %v1689_v17, %v1678_v16  ;;  %v2218_v38 = vsel %vm2210_vm4, %v3945_v46, %v2217_v13  ;;  %v2221_v42 = vsel %vm2211_vm3, %v2207_v14, 1326507024 }
 0x136   : > { %vm1700_vm10 = vcmp.eq.s32.totalorder %v3907_v12, 2  ;;  %v3971_v43 = vshrl.u32 %v2120_v3, 30  ;;  %v2222_v21 = vsel %vm2210_vm4, %v2204_v34, %v2221_v42  ;;  %v3975_v23 = vshll.u32 %v2184_v44, 8 }
 0x137   : > { %v1684_v24 = vadd.f32 1.0, %v1683_v5  ;;  %v1691_v6 = vadd.f32 1.0, %v1690_v51  ;;  %vm2011_vm11 = vcmp.eq.s32.totalorder %v2006_v35, 2  ;;  %v2223_v9 = vsel %vm2209_vm7, %v2220_v8, %v2222_v21 }
 0x138   : > { %v2122_v54 = vshll.u32 %v3971_v43, 30  ;;  %v2219_v57 = vsel %vm2209_vm7, %v2216_v15, %v2218_v38  ;;  %v2225_v1 = vand.u32 65535, %v3975_v23  ;;  %v2226_v18 = vshrl.u32 %v3975_v23, 16 }
 0x139   : > { %v1692_v45 = vmul.f32 %v1691_v6, %v1676_v63  ;;  %v1701_v39 = vxor.u32 2147483648, %v1684_v24  ;;  %v2227_v7 = vand.u32 65535, %v2223_v9  ;;  %v2228_v16 = vshrl.u32 %v2223_v9, 16 }
 0x13a   : > { %vm2007_vm9 = vcmp.lt.s32.totalorder %v2006_v35, 2  ;;  %vm2008_vm12 = vcmp.eq.s32.totalorder %v2006_v35, 0  ;;  %v2123_v26 = vsub.s32 %v2119_v53, %v2122_v54  ;;  %v2249_v2 = vand.u32 65535, %v2219_v57 }
 0x13b   : > { %v1698_v61 = vxor.u32 2147483648, %v1692_v45  ;;  %v1702_v0 = vsel %vm1700_vm10, %v1701_v39, %v1692_v45  ;;  %v2013_v19 = vsel %vm2011_vm11, %v1701_v39, %v1692_v45  ;;  %v2250_v48 = vshrl.u32 %v2219_v57, 16 }
 0x13c   : > { %vm2124_vm13 = vcmp.lt.s32.totalorder %v2123_v26, 0  ;;  %v2125_v58 = vsub.s32 0, %v2123_v26  ;;  %v2229_v47 = vmul.u32 %v2227_v7, %v2225_v1  ;;  %v2230_v36 = vmul.u32 %v2228_v16, %v2225_v1 }
 0x13d   : > { %v1699_v63 = vsel %vm1697_vm6, %v1684_v24, %v1698_v61  ;;  %v2010_v62 = vsel %vm2008_vm12, %v1684_v24, %v1698_v61  ;;  %v2231_v29 = vmul.u32 %v2227_v7, %v2226_v18  ;;  %v2232_v59 = vmul.u32 %v2228_v16, %v2226_v18 }
 0x13e   : > { %v1703_v31 = vsel %vm1696_vm5, %v1699_v63, %v1702_v0  ;;  %v2014_v10 = vsel %vm2007_vm9, %v2010_v62, %v2013_v19  ;;  %v2126_v11 = vsel %vm2124_vm13, %v2125_v58, %v2123_v26  ;;  %v2233_v40 = vshll.u32 %v2230_v36, 16 }
 0x13f   : > { %v1704_v34 = vsel %vm1693_vm8, nan, %v1703_v31  ;;  %v2015_v14 = vsel %vm1693_vm8, nan, %v2014_v10  ;;  %v2127_v49 = vclz %v2126_v11  ;;  %v2235_v4 = vshll.u32 %v2231_v29, 16 }
 0x140   : > { %2804 = vst [vmem:[%s3100_s26 + $0x58] sm:$0xff] %v1704_v34  ;;  %vm2237_vm14 = vc.u32 %v2229_v47, %v2233_v40  ;;  %v2239_v60 = vadd.s32 %v2233_v40, %v2229_v47  ;;  %v2252_v44 = vmul.u32 %v2250_v48, %v2225_v1  ;;  %v2115_v35 = vadd.s32 %v3921_v30, %v3919_v37 }
 0x141   : > { %2812 = vst [vmem:[%s3100_s26 + $0x68] sm:$0xff] %v2015_v14  ;;  %v2814_v53 = vadd.s32 4294967294, %v2127_v49  ;;  %v2238_v12 = vsel %vm2237_vm14, 1, %v2984_v50  ;;  %v2253_v17 = vmul.u32 %v2249_v2, %v2226_v18  ;;  %v2251_v3 = vmul.u32 %v2249_v2, %v2225_v1 }
 0x142   : > { %v2240_v52 = vadd.s32 %v2238_v12, %v2232_v59  ;;  %vm2241_vm15 = vc.u32 %v2239_v60, %v2235_v4  ;;  %v2255_v15 = vshll.u32 %v2252_v44, 16  ;;  %v2234_v8 = vshrl.u32 %v2230_v36, 16 }
 0x143   : > { %vm2815_vm0 = vcmp.lt.s32.totalorder %v2814_v53, 0  ;;  %v2242_v28 = vsel %vm2241_vm15, 1, %v2984_v50  ;;  %v2254_v5 = vmul.u32 %v2250_v48, %v2226_v18  ;;  %v2192_v24 = vshrl.u32 %v2978_v27, %v3910_v56 }
 0x144   : > { %v2130_v13 = vsel %vm2815_vm0, 0, %v2814_v53  ;;  %v2244_v21 = vadd.s32 %v2242_v28, %v2240_v52  ;;  %v2257_v6 = vshll.u32 %v2253_v17, 16  ;;  %vm2259_vm2 = vc.u32 %v2251_v3, %v2255_v15 }
 0x145   : > { %v2131_v51 = vsub.s32 32, %v2130_v13  ;;  %v2132_v38 = vshll.u32 %v2123_v26, %v2130_v13  ;;  %v2135_v42 = vsub.s32 4294967266, %v2130_v13  ;;  %v2213_v9 = vsel %vm2211_vm3, %v3945_v46, 2102212464 }
 0x146   : > { %v2236_v54 = vshrl.u32 %v2231_v29, 16  ;;  %v2260_v57 = vsel %vm2259_vm2, 1, %v2984_v50  ;;  %v2261_v1 = vadd.s32 %v2255_v15, %v2251_v3  ;;  %v2245_v39 = vadd.s32 %v2244_v21, %v2234_v8 }
 0x147   : > { %v2133_v37 = vshrl.u32 %v2115_v35, %v2131_v51  ;;  %v2136_v30 = vadd.s32 127, %v2135_v42  ;;  %v2262_v7 = vadd.s32 %v2260_v57, %v2254_v5  ;;  %v2212_v27 = vsel %vm2208_vm1, %v2192_v24, %v3941_v33 }
 0x148   : > { %v2256_v56 = vshrl.u32 %v2252_v44, 16  ;;  %vm2263_vm5 = vc.u32 %v2261_v1, %v2257_v6  ;;  %v2214_v46 = vsel %vm2210_vm4, %v3943_v41, %v2213_v9  ;;  %v2258_v61 = vshrl.u32 %v2253_v17, 16 }
 0x149   : > { %v2134_v18 = vor.u32 %v2133_v37, %v2132_v38  ;;  %v2137_v45 = vshll.u32 %v2136_v30, 23  ;;  %v2264_v2 = vsel %vm2263_vm5, 1, %v2984_v50  ;;  %v2246_v48 = vadd.s32 %v2245_v39, %v2236_v54 }
 0x14a   : > { %v2266_v0 = vadd.s32 %v2264_v2, %v2262_v7  ;;  %v2265_v58 = vadd.s32 %v2261_v1, %v2257_v6  ;;  %v2215_v47 = vsel %vm2209_vm7, %v2212_v27, %v2214_v46  ;;  %vm2023_vm1 = vcmp.lt.s32.totalorder %v3717_v32, 0 }
 0x14b   : > { %v2138_v16 = vor.u32 4788187, %v2137_v45  ;;  %v2141_v26 = vcvt.s32.f32 %v2134_v18  ;;  %v2145_v63 = vsub.s32 4, %v3971_v43  ;;  %vm2022_vm3 = vcmp.le.f32.partialorder %v2021_v22, 0.7853982 }
 0x14c   : > { %v2267_v36 = vadd.s32 %v2266_v0, %v2256_v56  ;;  %v2269_v50 = vmul.u32 %v3975_v23, %v2215_v47  ;;  %vm2271_vm4 = vc.u32 %v2246_v48, %v2265_v58  ;;  %vm2164_vm11 = vweird.f32 %v3717_v32 }
 0x14d   : > { %v2139_v19 = vand.u32 2147483647, %v2138_v16  ;;  %v2146_v31 = vsel %vm2023_vm1, %v2145_v63, %v3971_v43  ;;  %v2270_v30 = vadd.s32 %v2265_v58, %v2246_v48  ;;  %vm2178_vm15 = vcmp.lt.s32.totalorder %v3794_v20, 0 }
 0x14e   : > { %v2268_v62 = vadd.s32 %v2267_v36, %v2258_v61  ;;  %v2148_v34 = vsel %vm2022_vm3, 0, %v2146_v31  ;;  %vm2177_vm0 = vcmp.le.f32.partialorder %v2176_v55, 0.7853982 }
 0x14f   : > { %v2142_v33 = vmul.f32 %v2141_v26, %v2139_v19  ;;  %v2165_v12 = vadd.s32 3, %v2148_v34  ;;  %v2478_v57 = vand.u32 3, %v2148_v34 }
 0x150   : > { %v2272_v29 = vadd.s32 1, %v2268_v62 }
 0x151   : > { %v2143_v41 = vxor.u32 2147483648, %v2142_v33  ;;  %v2166_v43 = vand.u32 3, %v2165_v12  ;;  %vm2479_vm12 = vcmp.lt.s32.totalorder %v2478_v57, 2  ;;  %vm2480_vm13 = vcmp.eq.s32.totalorder %v2478_v57, 0 }
 0x152   : > { %v2273_v10 = vsel %vm2271_vm4, %v2272_v29, %v2268_v62  ;;  %vm2483_vm14 = vcmp.eq.s32.totalorder %v2478_v57, 2 }
 0x153   : > { %v2144_v59 = vsel %vm2023_vm1, %v2143_v41, %v2142_v33  ;;  %v2274_v40 = vadd.s32 %v2273_v10, %v2269_v50  ;;  %vm2171_vm7 = vcmp.eq.s32.totalorder %v2166_v43, 2  ;;  %vm2168_vm8 = vcmp.eq.s32.totalorder %v2166_v43, 0 }
 0x154   : > { %v2147_v25 = vsel %vm2022_vm3, %v3717_v32, %v2144_v59  ;;  %vm2167_vm10 = vcmp.lt.s32.totalorder %v2166_v43, 2 }
 0x155   : > { %v2149_v11 = vmul.f32 %v2147_v25, %v2147_v25  ;;  %v2275_v4 = vadd.s32 536870912, %v2274_v40 }
 0x157   : > { %v2150_v14 = vmul.f32 -0.001358992, %v2149_v11  ;;  %v2157_v49 = vmul.f32 -0.00019511016, %v2149_v11  ;;  %v2276_v22 = vshrl.u32 %v2275_v4, 30 }
 0x159   : > { %v2151_v60 = vadd.f32 0.041655596, %v2150_v14  ;;  %v2158_v53 = vadd.f32 0.008332121, %v2157_v49  ;;  %v2277_v35 = vshll.u32 %v2276_v22, 30  ;;  %v2300_v36 = vsub.s32 4, %v2276_v22 }
 0x15b   : > { %v2152_v44 = vmul.f32 %v2151_v60, %v2149_v11  ;;  %v2159_v23 = vmul.f32 %v2158_v53, %v2149_v11  ;;  %v2278_v28 = vsub.s32 %v2274_v40, %v2277_v35  ;;  %v2301_v62 = vsel %vm2178_vm15, %v2300_v36, %v2276_v22 }
 0x15c   : > { %v2303_v29 = vsel %vm2177_vm0, 0, %v2301_v62 }
 0x15d   : > { %v2153_v52 = vadd.f32 -0.4999988, %v2152_v44  ;;  %v2160_v17 = vadd.f32 -0.16666654, %v2159_v23  ;;  %vm2279_vm6 = vcmp.lt.s32.totalorder %v2278_v28, 0  ;;  %v2280_v13 = vsub.s32 0, %v2278_v28 }
 0x15e   : > { %v2320_v10 = vadd.s32 3, %v2303_v29  ;;  %v2632_v4 = vand.u32 3, %v2303_v29 }
 0x15f   : > { %v2154_v3 = vmul.f32 %v2153_v52, %v2149_v11  ;;  %v2161_v15 = vmul.f32 %v2160_v17, %v2149_v11  ;;  %v2281_v51 = vsel %vm2279_vm6, %v2280_v13, %v2278_v28 }
 0x160   : > { %v2282_v38 = vclz %v2281_v51  ;;  %v2321_v49 = vand.u32 3, %v2320_v10  ;;  %vm2637_vm5 = vcmp.eq.s32.totalorder %v2632_v4, 2  ;;  %vm2634_vm4 = vcmp.eq.s32.totalorder %v2632_v4, 0 }
 0x161   : > { %v2155_v8 = vadd.f32 1.0, %v2154_v3  ;;  %v2162_v5 = vadd.f32 1.0, %v2161_v15  ;;  %vm2633_vm6 = vcmp.lt.s32.totalorder %v2632_v4, 2 }
 0x162   : > { %v2817_v24 = vadd.s32 4294967294, %v2282_v38  ;;  %vm2326_vm2 = vcmp.eq.s32.totalorder %v2321_v49, 2  ;;  %vm2322_vm1 = vcmp.lt.s32.totalorder %v2321_v49, 2  ;;  %vm2323_vm3 = vcmp.eq.s32.totalorder %v2321_v49, 0 }
 0x163   : > { %v2163_v42 = vmul.f32 %v2162_v5, %v2147_v25  ;;  %v2172_v21 = vxor.u32 2147483648, %v2155_v8 }
 0x164   : > { %vm2818_vm9 = vcmp.lt.s32.totalorder %v2817_v24, 0 }
 0x165   : > { %v2169_v6 = vxor.u32 2147483648, %v2163_v42  ;;  %v2173_v37 = vsel %vm2171_vm7, %v2172_v21, %v2163_v42  ;;  %v2285_v54 = vsel %vm2818_vm9, 0, %v2817_v24  ;;  %v2485_v2 = vsel %vm2483_vm14, %v2172_v21, %v2163_v42 }
 0x166   : > { %v2286_v18 = vsub.s32 32, %v2285_v54  ;;  %v2287_v45 = vshll.u32 %v2278_v28, %v2285_v54  ;;  %v2290_v39 = vsub.s32 4294967266, %v2285_v54  ;;  %vm2319_vm7 = vweird.f32 %v3794_v20 }
 0x167   : > { %v2170_v9 = vsel %vm2168_vm8, %v2155_v8, %v2169_v6  ;;  %v2482_v16 = vsel %vm2480_vm13, %v2155_v8, %v2169_v6 }
 0x168   : > { %v2174_v1 = vsel %vm2167_vm10, %v2170_v9, %v2173_v37  ;;  %v2288_v27 = vshrl.u32 %v2270_v30, %v2286_v18  ;;  %v2291_v56 = vadd.s32 127, %v2290_v39  ;;  %v2486_v61 = vsel %vm2479_vm12, %v2482_v16, %v2485_v2 }
 0x169   : > { %v2175_v7 = vsel %vm2164_vm11, nan, %v2174_v1  ;;  %v2487_v48 = vsel %vm2164_vm11, nan, %v2486_v61 }
 0x16a   : > { %2819 = vst [vmem:[%s3100_s26 + $0x70] sm:$0xff] %v2175_v7  ;;  %v2289_v26 = vor.u32 %v2288_v27, %v2287_v45  ;;  %v2292_v46 = vshll.u32 %v2291_v56, 23 }
 0x16b   : > { %2827 = vst [vmem:[%s3100_s26 + $0x80] sm:$0xff] %v2487_v48 }
 0x16c   : > { %v2293_v0 = vor.u32 4788187, %v2292_v46  ;;  %v2296_v19 = vcvt.s32.f32 %v2289_v26 }
 0x16e   : > { %v2294_v58 = vand.u32 2147483647, %v2293_v0 }
 0x170   : > { %v2297_v47 = vmul.f32 %v2296_v19, %v2294_v58 }
 0x172   : > { %v2298_v33 = vxor.u32 2147483648, %v2297_v47 }
 0x174   : > { %v2299_v63 = vsel %vm2178_vm15, %v2298_v33, %v2297_v47 }
 0x175   : > { %v2302_v41 = vsel %vm2177_vm0, %v3794_v20, %v2299_v63 }
 0x176   : > { %v2304_v50 = vmul.f32 %v2302_v41, %v2302_v41 }
 0x178   : > { %v2305_v59 = vmul.f32 -0.001358992, %v2304_v50  ;;  %v2312_v31 = vmul.f32 -0.00019511016, %v2304_v50 }
 0x17a   : > { %v2306_v32 = vadd.f32 0.041655596, %v2305_v59  ;;  %v2313_v25 = vadd.f32 0.008332121, %v2312_v31 }
 0x17c   : > { %v2307_v11 = vmul.f32 %v2306_v32, %v2304_v50  ;;  %v2314_v40 = vmul.f32 %v2313_v25, %v2304_v50 }
 0x17e   : > { %v2308_v34 = vadd.f32 -0.4999988, %v2307_v11  ;;  %v2315_v14 = vadd.f32 -0.16666654, %v2314_v40 }
 0x180   : > { %v2309_v60 = vmul.f32 %v2308_v34, %v2304_v50  ;;  %v2316_v55 = vmul.f32 %v2315_v14, %v2304_v50 }
 0x182   : > { %v2310_v53 = vadd.f32 1.0, %v2309_v60  ;;  %v2317_v12 = vadd.f32 1.0, %v2316_v55 }
 0x184   : > { %v2318_v22 = vmul.f32 %v2317_v12, %v2302_v41  ;;  %v2327_v44 = vxor.u32 2147483648, %v2310_v53 }
 0x186   : > { %v2324_v23 = vxor.u32 2147483648, %v2318_v22  ;;  %v2328_v35 = vsel %vm2326_vm2, %v2327_v44, %v2318_v22  ;;  %v2639_v52 = vsel %vm2637_vm5, %v2327_v44, %v2318_v22 }
 0x188   : > { %v2325_v17 = vsel %vm2323_vm3, %v2310_v53, %v2324_v23  ;;  %v2636_v28 = vsel %vm2634_vm4, %v2310_v53, %v2324_v23 }
 0x189   : > { %v2329_v43 = vsel %vm2322_vm1, %v2325_v17, %v2328_v35  ;;  %v2640_v3 = vsel %vm2633_vm6, %v2636_v28, %v2639_v52 }
 0x18a   : > { %v2330_v15 = vsel %vm2319_vm7, nan, %v2329_v43  ;;  %v2641_v13 = vsel %vm2319_vm7, nan, %v2640_v3 }
 0x18b   : > { %2820 = vst [vmem:[%s3100_s26 + $0x78] sm:$0xff] %v2330_v15 }
 0x18c   : > { %2828 = vst [vmem:[%s3100_s26 + $0x88] sm:$0xff] %v2641_v13 }
 0x18d   : > { %s2834_s27 = sshll.u32 %s3023_s10, 4  ;;  %s2668_s28 = sshll.u32 %s3100_s26, 4  ;;  %s2669_s28 = int_to_ptr.vmem [resolvable:$true] %s2668_s28 }
 0x18e   : > { %s2657_s2 = scalar_lea.hbm %s4076_s1, %s2834_s27  ;;  %s2985_s4 = smov 256  }
 0x18f   : > { %s2670_s3 = sshll.u32 %s2657_s2, 4  ;;  %2838 = sst [smem:[#allocation7]] (%p3051_p10), %s2985_s4  ;;  %s2671_s3 = int_to_ptr.hbm [resolvable:$true] %s2670_s3 }
 0x190   : > { %s2986_s5 = smov 2048   ;;  %s2987_s11 = smov 2  }
 0x191   : > { %2839 = sst [smem:[#allocation7 + $0x1]] (%p3051_p10), %s2986_s5  ;;  %s2988_s10 = smov 128  }
 0x192   : > { %2840 = sst [smem:[#allocation7 + $0x2]] (%p3051_p10), %s2987_s11  ;;  %s2989_s13 = smov 8  }
 0x193   : > { %2841 = sst [smem:[#allocation7 + $0x3]] (%p3051_p10), %s2988_s10  ;;  %s2990_s14 = smov [#allocation6]  }
 0x194   : > { %2842 = sst [smem:[#allocation7 + $0x4]] (%p3051_p10), %s2988_s10  ;;  %s2991_s16 = smov 0  }
 0x195   : > { %2843 = sst [smem:[#allocation7 + $0x5]] (%p3051_p10), %s2989_s13 }
 0x196   : > { %2844 = dma.general (%p3051_p10), %s2669_s28, 2304, %s2671_s3, %s2646_s17, %s2990_s14, [#allocation7], %s2991_s16, 0  }
 0x197 PF: > { %p2855_p6 = scmp.ge.s32.totalorder %s2974_s9, 2  ;;  %s2698_s20 = sand.u32 1, %s2962_s6  }
 0x198   : > { %s2699_s21 = scalar_lea.sflag [#allocation4], %s2698_s20 }
 0x199   : > { %p2851_p12 = pnand %p2855_p6, %p3055_p11 }
 0x19b   : > { %p2852_p13 = pneg %p2851_p12 }
 0x19d   : > { %2957 = dma.done.wait (%p2852_p13), %s2699_s21, 2304  }
 0x19e   : > { %2959 = vsyncadd (%p2852_p13), %s2699_s21, 4294964992  ;;  %p14_p0 = scmp.ge.s32.totalorder %s3027_s12, 10   ;;  %s4094_s6 = smov %s2966_s7 }
 0x19f   : > { %s4095_s7 = smov %s2970_s8  ;;  %s4096_s8 = smov %s3039_s15 }
 0x1a0   : > { %s4097_s9 = smov %s3027_s12  ;;  %16 = sbr.rel (!%p14_p0) target bundleno = 5 (0x5), region = 82 }
 0x1a5   :  { %2705 = vsyncpa [#allocation3], 1 }
 0x1a6   :  { %2707 = vsyncpa [#allocation3 + $0x1], 1 }
 0x1a7   :  { %2708 = vsyncpa [#allocation4], 1 }
 0x1a8   :  { %2710 = vsyncpa [#allocation4 + $0x1], 1 }

</bundles_post_ra>
